<compile_context>
chip_gen: v5e
topology: v5e:2x2
jax: 0.10.0
libtpu: 0.0.40
codegen_flags: <defaults>
</compile_context>

<pallas_src>
import jax
import jax.numpy as jnp
from jax import lax
from jax.experimental import pallas as pl
from jax.experimental.pallas import tpu as pltpu


_LANE = 128                   # lane (output-feature) granularity
_SUB = 8                      # f32 sublane granularity
_MIN_PALLAS_ELEMS = 1 << 15   # below this many output elems, fused XLA wins


def _round_up(x, m):
    return (x + m - 1) // m * m


# ---------------------------------------------------------------------------
# One-time parameter packing.  For inference, call once outside the hot path;
# if the parameters are being trained, re-run it inside the jitted step (the
# fold / transpose / pad are differentiable).
# ---------------------------------------------------------------------------
def prepare_output_gau_params(weight, bias, feature_scalar,
                              hidden_dim, output_batch_num, infer_library_size):
    """Fold feature_scalar, transpose W to (K_pad, D_out_pad), pad K->8, D_out->128.

    weight        : (D_out, D_in)   nn.Linear layout, D_in = H + B + lib
    bias          : (D_out,)
    feature_scalar: (D_out,) or None (feature_factor=False)
    """
    d_out, d_in = weight.shape
    assert d_in == hidden_dim + output_batch_num + int(infer_library_size)

    w, b = weight, bias
    if feature_scalar is not None:
        # (x @ W.T + b) * s  ==  x @ (s[:, None] * W).T + b * s
        w = w * feature_scalar[:, None]
        b = b * feature_scalar

    k_pad = _round_up(d_in, _SUB)
    d_out_p = _round_up(d_out, _LANE)
    # (K_pad, D_out_pad): contraction axis on sublanes, output features on
    # lanes -> lane-dense weight DMA and the MXU RHS is fed without an XLU
    # transpose.  Zero padding keeps the contraction exact.
    wt = jnp.pad(w.T, ((0, k_pad - d_in), (0, d_out_p - d_out)))
    b = jnp.pad(b, ((0, d_out_p - d_out),)).reshape(1, d_out_p)
    return dict(w=wt, b=b, d_in=d_in, k_pad=k_pad, d_out=d_out)


# ---------------------------------------------------------------------------
# Kernel: one MXU dot per (tm, tn) output tile + bias add.
# ---------------------------------------------------------------------------
def _output_gau_kernel(x_ref, w_ref, b_ref, o_ref):
    acc = lax.dot_general(
        x_ref[...], w_ref[...],
        dimension_numbers=(((1,), (0,)), ((), ())),   # (M,K) . (K,N)
        preferred_element_type=jnp.float32,
        precision=lax.Precision.HIGHEST)
    o_ref[...] = (acc + b_ref[...]).astype(o_ref.dtype)


# ---------------------------------------------------------------------------
# Forward
# ---------------------------------------------------------------------------
def _pallas_forward(x, params, tm_max, tn_max):
    n, k_pad = x.shape
    w, b = params["w"], params["b"]
    d_out = params["d_out"]
    d_out_p = w.shape[1]
    out_dtype = x.dtype

    sub = {4: 8, 2: 16, 1: 32}.get(x.dtype.itemsize, 8)
    tm = min(tm_max, _round_up(n, sub))
    tn = min(_round_up(tn_max, _LANE), d_out_p)        # multiple of 128

    gi, gj = pl.cdiv(n, tm), pl.cdiv(d_out, tn)
    if gi == 1 and gj == 1:
        # v7x has 2 TensorCores: ensure a "parallel" axis has >= 2 blocks.
        if n >= 2 * sub:
            tm = _round_up(pl.cdiv(n, 2), sub)
        elif d_out > _LANE:
            tn = max(_LANE, _round_up(pl.cdiv(d_out, 2), _LANE))
        gi, gj = pl.cdiv(n, tm), pl.cdiv(d_out, tn)

    # VMEM budget from the actual footprint (double-buffered tiles + f32 acc),
    # with headroom; clamped to stay within every generation's physical VMEM.
    fp = (2 * tm * max(k_pad, _LANE) * x.dtype.itemsize   # activation tiles
          + 2 * k_pad * tn * w.dtype.itemsize             # weight tiles
          + 2 * _SUB * tn * 4                             # bias tiles (sublane pad)
          + 2 * tm * tn * out_dtype.itemsize              # output tiles
          + tm * tn * 4)                                  # f32 accumulator temp
    vmem_limit = max(32 << 20, min(int(fp * 1.5) + (1 << 20), 64 << 20))

    # D_out blocks OUTERMOST (j), N blocks innermost (i): the weight / bias
    # block index (0, j) is constant across consecutive steps, so those tiles
    # are fetched once per j-block rather than every grid step.
    return pl.pallas_call(
        _output_gau_kernel,
        out_shape=jax.ShapeDtypeStruct((n, d_out), out_dtype),   # unpadded: no slice copy
        grid=(gj, gi),
        in_specs=[
            pl.BlockSpec((tm, k_pad), lambda j, i: (i, 0)),      # activations
            pl.BlockSpec((k_pad, tn), lambda j, i: (0, j)),      # weight (K, N)
            pl.BlockSpec((1, tn), lambda j, i: (0, j)),          # bias row
        ],
        out_specs=pl.BlockSpec((tm, tn), lambda j, i: (i, j)),
        compiler_params=pltpu.CompilerParams(
            dimension_semantics=("parallel", "parallel"),
            vmem_limit_bytes=vmem_limit,
        ),
    )(x, w, b)


def output_module_gau_forward(latent_rep, output_batch, lib, latent_lib, params,
                              *, min_pallas_elems=_MIN_PALLAS_ELEMS,
                              tm_max=512, tn_max=1024):
    """JAX/Pallas equivalent of Output_Module_Gau.forward.

    `lib` is unused (kept only for signature parity with the PyTorch module).
    `params` comes from prepare_output_gau_params.
    """
    del lib  # unused in the original module as well
    n = latent_rep.shape[0]
    d_out, d_in, k_pad = params["d_out"], params["d_in"], params["k_pad"]

    # Fused "concat": build the single (N, K_pad) activation here.  Its HBM
    # cost (N * ~40 * 4 B) is negligible vs the (N, D_out) output writeback.
    parts = [latent_rep]
    if output_batch is not None and output_batch.shape[1] > 0:
        parts.append(output_batch)
    if latent_lib is not None:
        parts.append(latent_lib)
    width = sum(p.shape[1] for p in parts)
    assert width == d_in, (width, d_in)
    if k_pad > d_in:
        parts.append(jnp.zeros((n, k_pad - d_in), dtype=latent_rep.dtype))
    x = parts[0] if len(parts) == 1 else jnp.concatenate(parts, axis=1)

    if n * d_out < min_pallas_elems:
        # Tiny-problem fallback: pallas_call launch / per-step overhead
        # dominates at toy sizes; let XLA fuse dense + bias.
        y = jnp.dot(x, params["w"], precision=lax.Precision.HIGHEST) + params["b"]
        return y[:, :d_out].astype(latent_rep.dtype)

    return _pallas_forward(x, params, tm_max, tn_max)


# ---------------------------------------------------------------------------
# Demo / self-test
# ---------------------------------------------------------------------------
if __name__ == "__main__":
    def run_case(key, n, hidden_last, output_batch_num, infer_library_size,
                 feature_factor, output_dim, tm_max=512, tn_max=1024):
        d_in = hidden_last + output_batch_num + int(infer_library_size)
        ks = jax.random.split(key, 6)
        latent_rep = jax.random.normal(ks[0], (n, hidden_last), dtype=jnp.float32)
        output_batch = (jax.random.normal(ks[1], (n, output_batch_num),
                                          dtype=jnp.float32)
                        if output_batch_num > 0 else None)
        latent_lib = (jax.random.normal(ks[2], (n, 1), dtype=jnp.float32)
                      if infer_library_size else None)
        bound = float(d_in) ** -0.5
        weight = jax.random.uniform(ks[3], (output_dim, d_in), dtype=jnp.float32,
                                    minval=-bound, maxval=bound)
        bias = jax.random.uniform(ks[4], (output_dim,), dtype=jnp.float32,
                                  minval=-bound, maxval=bound)
        # NOTE: the PyTorch module initializes feature_scalar to zeros (output
        # would be identically zero); use a non-trivial scalar here so the
        # parameter fold is actually exercised.  Semantics are unchanged.
        feature_scalar = (jax.random.uniform(ks[5], (output_dim,),
                                             dtype=jnp.float32,
                                             minval=0.5, maxval=1.5)
                          if feature_factor else None)

        params = prepare_output_gau_params(
            weight, bias, feature_scalar, hidden_dim=hidden_last,
            output_batch_num=output_batch_num,
            infer_library_size=infer_library_size)

        out = output_module_gau_forward(latent_rep, output_batch, None,
                                        latent_lib, params,
                                        tm_max=tm_max, tn_max=tn_max)
        out = jax.block_until_ready(out)

        # Pure-JAX reference of the original module's forward (f32 matmul).
        x = latent_rep
        if output_batch is not None:
            x = jnp.concatenate([x, output_batch], axis=1)
        if latent_lib is not None:
            x = jnp.concatenate([x, latent_lib], axis=1)
        ref = jnp.dot(x, weight.T, precision=lax.Precision.HIGHEST) + bias
        if feature_scalar is not None:
            ref = ref * feature_scalar

        assert out.shape == (n, output_dim), (out.shape, (n, output_dim))
        err = float(jnp.max(jnp.abs(out - ref)))
        assert jnp.allclose(out, ref, atol=2e-3, rtol=2e-3), f"max abs err {err}"

    root = jax.random.PRNGKey(0)
    k1, k2, k3 = jax.random.split(root, 3)

    # 1) Module-default tiny shape (N*D_out below the gate -> fused XLA path).
    run_case(k1, n=8, hidden_last=32, output_batch_num=4,
             infer_library_size=True, feature_factor=True, output_dim=16)

    # 2) Pallas path: D_out not a multiple of 128 (unpadded out_shape, masked
    #    vst on the last D_out block), folded feature_scalar, fused concat of
    #    all three inputs, 2x2 grid with D_out blocks outermost.
    run_case(k2, n=256, hidden_last=32, output_batch_num=4,
             infer_library_size=True, feature_factor=True, output_dim=500,
             tm_max=128, tn_max=256)

    # 3) Pallas path without the optional inputs (no output_batch, no library
    #    size, no feature scalar); the (1,1)-grid tile choice is split so a
    #    parallel axis has >=2 blocks (both v7x TensorCores get work).
    run_case(k3, n=160, hidden_last=32, output_batch_num=0,
             infer_library_size=False, feature_factor=False, output_dim=256)

    print("KERNEL_OK")
</pallas_src>

<mosaic_0001>
module attributes {stable_mosaic.version = 11 : i64} {
  func.func @_output_gau_kernel(%arg0: i32, %arg1: i32, %arg2: memref<128x40xf32, #tpu.memory_space<vmem>>, %arg3: memref<40x256xf32, #tpu.memory_space<vmem>>, %arg4: memref<1x256xf32, #tpu.memory_space<vmem>>, %arg5: memref<128x256xf32, #tpu.memory_space<vmem>>) attributes {dimension_semantics = [#tpu.dimension_semantics<parallel>, #tpu.dimension_semantics<parallel>], iteration_bounds = array<i64: 2, 2>, scalar_prefetch = 0 : i64, scratch_operands = 0 : i64, tpu.core_type = #tpu.core_type<tc>, window_params = [{transform_indices = @transform_0, window_bounds = array<i64: 128, 40>}, {transform_indices = @transform_1, window_bounds = array<i64: 40, 256>}, {transform_indices = @transform_2, window_bounds = array<i64: 1, 256>}, {transform_indices = @transform_3, window_bounds = array<i64: 128, 256>}]} {
    %c0 = arith.constant 0 : index
    %c0_0 = arith.constant 0 : index
    %0 = vector.load %arg2[%c0, %c0_0] : memref<128x40xf32, #tpu.memory_space<vmem>>, vector<128x40xf32>
    %c0_1 = arith.constant 0 : index
    %c0_2 = arith.constant 0 : index
    %1 = vector.load %arg3[%c0_1, %c0_2] : memref<40x256xf32, #tpu.memory_space<vmem>>, vector<40x256xf32>
    %cst = arith.constant dense<0.000000e+00> : vector<128x256xf32>
    %2 = tpu.matmul %0, %1, %cst {dimension_numbers = #tpu.dot_dimension_numbers<[1], [0], [0], [1], [0, 0, 1, 1], [], []>, precision = #tpu.contract_precision<fp32>} : vector<128x40xf32>, vector<40x256xf32>, vector<128x256xf32> -> vector<128x256xf32>
    %c0_3 = arith.constant 0 : index
    %c0_4 = arith.constant 0 : index
    %3 = vector.load %arg4[%c0_3, %c0_4] : memref<1x256xf32, #tpu.memory_space<vmem>>, vector<1x256xf32>
    %4 = vector.broadcast %3 : vector<1x256xf32> to vector<128x256xf32>
    %5 = arith.addf %2, %4 : vector<128x256xf32>
    %c0_5 = arith.constant 0 : index
    %c0_6 = arith.constant 0 : index
    %6 = vector.load %arg5[%c0_5, %c0_6] : memref<128x256xf32, #tpu.memory_space<vmem>>, vector<128x256xf32>
    tpu.vector_store %arg5[%c0_5, %c0_6], %5 {strides = array<i32>} : memref<128x256xf32, #tpu.memory_space<vmem>>, vector<128x256xf32>,
    return
  }
  func.func @transform_0(%arg0: i32, %arg1: i32) -> (i32, i32) {
    %c0_i32 = arith.constant 0 : i32
    %c0_i32_0 = arith.constant 0 : i32
    return %arg1, %c0_i32 : i32, i32
  }
  func.func @transform_1(%arg0: i32, %arg1: i32) -> (i32, i32) {
    %c0_i32 = arith.constant 0 : i32
    %c0_i32_0 = arith.constant 0 : i32
    return %c0_i32, %arg0 : i32, i32
  }
  func.func @transform_2(%arg0: i32, %arg1: i32) -> (i32, i32) {
    %c0_i32 = arith.constant 0 : i32
    %c0_i32_0 = arith.constant 0 : i32
    return %c0_i32, %arg0 : i32, i32
  }
  func.func @transform_3(%arg0: i32, %arg1: i32) -> (i32, i32) {
    %c0_i32 = arith.constant 0 : i32
    return %arg1, %arg0 : i32, i32
  }
}

</mosaic_0001>

<bundles_post_ra>
// kernel: tpu_custom_call.1
= control target key start
LH: loop header
LB: loop body
LE: loop exit
PB: predicated region body
PF: predicated region fallthrough
CT: control target
= control target key end

     0   :  { %s2070_s12 = smov 0   ;;  %s2072_s13 = smov 0   ;;  %s2995_s0 = inlined_call_operand.vmem [shape: f32[256,40], index: 0, kind: input, shape index: {}]   ;;  %s2996_s1 = inlined_call_operand.vmem [shape: f32[40,512], index: 1, kind: input, shape index: {}]   ;;  %s2997_s2 = inlined_call_operand.vmem [shape: f32[1,512], index: 2, kind: input, shape index: {}]   ;;  %s2998_s3 = inlined_call_operand.vmem [shape: f32[256,500], index: 3, kind: output, shape index: {}]  }
   0x1   :  { %s2074_s14 = smov 0   ;;  %s2076_s15 = smov 0  }
   0x2   :  { %s2078_s16 = smov 0   ;;  %s2080_s17 = smov 0  }
   0x3   :  { %s2082_s18 = smov 0   ;;  %s2084_s19 = smov 0  }
   0x4   :  { %s2086_s20 = smov 0  }
   0x5 LB: > { %s22_s21 = sadd.s32 1, %s2040_s18  ;;  %s25_s22 = sadd.s32 1, %s2044_s19  ;;  %s2048_s20 = sphi %s2086_s20, %s13_s20   ;;  %s2044_s19 = sphi %s2084_s19, %s3054_s19   ;;  %s2040_s18 = sphi %s2082_s18, %s3053_s18   ;;  %s2036_s17 = sphi %s2080_s17, %s3052_s17   ;;  %s2032_s16 = sphi %s2078_s16, %s3051_s16   ;;  %s2028_s15 = sphi %s2076_s15, %s3050_s15   ;;  %s2024_s14 = sphi %s2074_s14, %s3049_s14   ;;  %s2020_s13 = sphi %s2072_s13, %s3048_s13   ;;  %s2016_s12 = sphi %s2070_s12, %s3047_s12  }
   0x6   : > { %p23_p0 = scmp.ge.s32.totalorder %s22_s21, 2  ;;  %p65_p1 = scmp.ne.s32.totalorder %s2028_s15, %s2024_s14 }
   0x7   : > { %s1884_s23 = sadd.s32 4294967295, %s2048_s20   ;;  %p66_p2 = scmp.eq.s32.totalorder %s2048_s20, 0 }
   0x8   : > { %s3056_s21 = smov (%p23_p0, %s22_s21), 0  ;;  %s3058_s22 = smov (!%p23_p0, %s25_s22), %s2044_s19 }
   0x9   : > { %p27_p3 = scmp.ge.s32.totalorder %s3058_s22, 2  ;;  %s107_s24 = ssub.s32 %s2040_s18, %s3056_s21 }
   0xa   : > { %p2126_p4 = por %p66_p2, %p65_p1  ;;  %p122_p5 = scmp.ne.s32.totalorder %s2020_s13, %s2016_s12 }
   0xb   : > { %s3060_s22 = smov (%p27_p3, %s3058_s22), 0  ;;  %s58_s26 = sadd.s32 1, %s2028_s15 }
   0xc   : > { %p123_p6 = scmp.eq.s32.totalorder %s1884_s23, 3  ;;  %s55_s27 = ssub.s32 %s2044_s19, %s3060_s22 }
   0xd   : > { %s112_s28 = sadd.s32 1, %s2020_s13  ;;  %p56_p7 = scmp.eq.s32.totalorder %s55_s27, 0 }
   0xe   : > { %s109_s29 = sor.u32 %s107_s24, %s55_s27  ;;  %p2138_p9 = por %p123_p6, %p122_p5 }
   0xf   : > { %p110_p8 = scmp.eq.s32.totalorder %s109_s29, 0  ;;  %p1887_p10 = scmp.ge.s32.totalorder %s2048_s20, 4 }
  0x10   : > { %s2143_s4 = scalar_select %p56_p7, %s2028_s15, %s58_s26  }
  0x11   : > { %s2146_s5 = scalar_select %p110_p8, %s2020_s13, %s112_s28  }
  0x12   : > { %145 = sbr.rel (%p1887_p10) target bundleno = 37 (0x25), region = 16 }
  0x17   : > { %157 = sbr.rel (!%p2126_p4) target bundleno = 37 (0x25), region = 24  ;;  %s159_s6 = sand.u32 (%p2126_p4), 1, %s2028_s15  }
  0x18   : > { %s1902_s7 = sshll.u32 (%p2126_p4), %s2044_s19, 4  ;;  %s1904_s8 = smul.u32 (%p2126_p4), 80, %s159_s6 }
  0x19   : > { %s164_s11 = scalar_lea.vmem (%p2126_p4), %s2996_s1, %s1902_s7 }
  0x1a   : > { %v177_v0 = vld [vmem:[%s164_s11] sm:$0xff] (%p2126_p4)  ;;  %v179_v1 = vld [vmem:[%s164_s11 + $0x8] sm:$0xff] (%p2126_p4)  ;;  %s161_s23 = scalar_lea.vmem (%p2126_p4), [#allocation2], %s1904_s8 }
  0x1b   : > { %v181_v2 = vld [vmem:[%s164_s11 + $0x20] sm:$0xff] (%p2126_p4)  ;;  %178 = vst [vmem:[%s161_s23] sm:$0xff] (%p2126_p4), %v177_v0  ;;  %v183_v3 = vld [vmem:[%s164_s11 + $0x28] sm:$0xff] (%p2126_p4) }
  0x1c   : > { %180 = vst [vmem:[%s161_s23 + $0x8] sm:$0xff] %v179_v1  ;;  %v185_v4 = vld [vmem:[%s164_s11 + $0x40] sm:$0xff]  ;;  %v187_v5 = vld [vmem:[%s164_s11 + $0x48] sm:$0xff] }
  0x1d   : > { %182 = vst [vmem:[%s161_s23 + $0x10] sm:$0xff] %v181_v2  ;;  %v189_v6 = vld [vmem:[%s164_s11 + $0x60] sm:$0xff]  ;;  %v191_v7 = vld [vmem:[%s164_s11 + $0x68] sm:$0xff] }
  0x1e   : > { %184 = vst [vmem:[%s161_s23 + $0x18] sm:$0xff] %v183_v3  ;;  %v193_v8 = vld [vmem:[%s164_s11 + $0x80] sm:$0xff]  ;;  %v195_v9 = vld [vmem:[%s164_s11 + $0x88] sm:$0xff] }
  0x1f   : > { %186 = vst [vmem:[%s161_s23 + $0x20] sm:$0xff] %v185_v4 }
  0x20   : > { %188 = vst [vmem:[%s161_s23 + $0x28] sm:$0xff] %v187_v5 }
  0x21   : > { %190 = vst [vmem:[%s161_s23 + $0x30] sm:$0xff] %v189_v6 }
  0x22   : > { %192 = vst [vmem:[%s161_s23 + $0x38] sm:$0xff] %v191_v7 }
  0x23   : > { %194 = vst [vmem:[%s161_s23 + $0x40] sm:$0xff] %v193_v8 }
  0x24   : > { %196 = vst [vmem:[%s161_s23 + $0x48] sm:$0xff] %v195_v9 }
  0x25 PF: > { %p1890_p11 = scmp.ge.s32.totalorder %s2048_s20, 1  ;;  %p209_p12 = scmp.lt.s32.totalorder %s2048_s20, 5 }
  0x27   : > { %p210_p13 = pnand %p1890_p11, %p209_p12 }
  0x29   : > { %213 = sbr.rel (%p210_p13) target bundleno = 587 (0x24b), region = 51 }
  0x2e   : > { %s216_s24 = sand.u32 1, %s2024_s14   ;;  %s1892_s25 = sshll.u32 %s2032_s16, 4  ;;  %vm293_vm0 = vcmask 326656  }
  0x2f   : > { %s1905_s26 = smul.u32 80, %s216_s24  ;;  %p248_p0 = scmp.lt.s32.totalorder %s1892_s25, 31 }
  0x30   : > { %s2571_s7 = sshll.u32 %s2036_s17, 1  ;;  %s244_s11 = sand.u32 1, %s2016_s12  }
  0x31   : > { %s2160_s27 = scalar_lea.vmem [#allocation2], %s1905_s26  ;;  %s3062_s25 = smov (!%p248_p0, %s1892_s25), 31 }
  0x32   : > { %v285_v10 = vld [vmem:[%s2160_s27 + $0x40] sm:$0xff]  ;;  %v283_v11 = vld [vmem:[%s2160_s27 + $0x30] sm:$0xff]  ;;  %v286_v18 = vld [vmem:[%s2160_s27 + $0x48] sm:$0xff]  ;;  %s1893_s14 = sshll.u32 %s3062_s25, 3  ;;  %p255_p1 = scmp.lt.s32.totalorder %s2571_s7, 3 }
  0x33   : > { %v281_v12 = vld [vmem:[%s2160_s27 + $0x20] sm:$0xff]  ;;  %v2165_v13 = vand.u32 4294901760, %v285_v10  ;;  %v2167_v14 = vand.u32 4294901760, %v283_v11  ;;  %v279_v16 = vld [vmem:[%s2160_s27 + $0x10] sm:$0xff]  ;;  %v2178_v21 = vand.u32 4294901760, %v286_v18  ;;  %s2194_s6 = scalar_lea.vmem %s2995_s0, %s1893_s14  ;;  %v284_v45 = vld [vmem:[%s2160_s27 + $0x38] sm:$0xff] }
  0x34   : > { %v2169_v15 = vand.u32 4294901760, %v281_v12  ;;  %v277_v17 = vld [vmem:[%s2160_s27] sm:$0xff]  ;;  %v2174_v19 = vand.u32 4294901760, %v279_v16  ;;  %v262_v29 = vld [vmem:[%s2194_s6 + $0x8] sm:$0xff]  ;;  %v2255_v55 = vand.u32 4294901760, %v284_v45  ;;  %v264_v63 = vld [vmem:[%s2194_s6 + $0x18] sm:$0xff] }
  0x35   : > { %v2176_v20 = vand.u32 4294901760, %v277_v17  ;;  %354 = vmatpush.msra.mxu0 %v2165_v13  ;;  %v2182_v22 = vsub.f32 %v285_v10, %v2165_v13  ;;  %v2185_v23 = vsub.f32 %v283_v11, %v2167_v14  ;;  %717 = vmatpush.msra.mxu3 %v2165_v13  ;;  %v261_v26 = vld [vmem:[%s2194_s6] sm:$0xff]  ;;  %v2204_v28 = vsub.f32 %v286_v18, %v2178_v21  ;;  %v263_v44 = vld [vmem:[%s2194_s6 + $0x10] sm:$0xff]  ;;  %s256_s17 = scalar_select %p255_p1, %s2571_s7, 3 }
  0x36   : > { %v2189_v24 = vsub.f32 %v281_v12, %v2169_v15  ;;  %v2197_v25 = vsub.f32 %v279_v16, %v2174_v19  ;;  %v295_v32 = vsel %vm293_vm0, %v261_v26, 0  ;;  %v298_v41 = vsel %vm293_vm0, %v262_v29, 0  ;;  %v265_v10 = vld [vmem:[%s2194_s6 + $0x20] sm:$0xff]  ;;  %s1891_s23 = sshll.u32 %s244_s11, 8  ;;  %s1903_s24 = sshll.u32 (%p2138_p9), %s2032_s16, 6 }
  0x37   : > { %v2201_v27 = vsub.f32 %v277_v17, %v2176_v20  ;;  %611 = vmatpush.msra.mxu2 %v2182_v22  ;;  %356 = vmatpush.msra.mxu0 %v2167_v14  ;;  %v505_v30 = vand.u32 4294901760, %v2182_v22  ;;  %v511_v31 = vand.u32 4294901760, %v2185_v23  ;;  %v2214_v34 = vand.u32 4294901760, %v295_v32  ;;  %s257_s10 = scalar_lea.vmem %s2997_s2, %s256_s17  ;;  %s2722_s12 = scalar_lea.vmem [#allocation3], %s1891_s23 }
  0x38   : > { %v517_v33 = vand.u32 4294901760, %v2189_v24  ;;  %719 = vmatpush.msra.mxu3 %v2167_v14  ;;  %v523_v35 = vand.u32 4294901760, %v2197_v25  ;;  %v1168_v36 = vand.u32 4294901760, %v2204_v28  ;;  %v2241_v49 = vand.u32 4294901760, %v298_v41  ;;  %s1710_s25 = sadd.s32 (%p2138_p9), %s1903_s24, %s2571_s7 }
  0x39   : > { %v529_v37 = vand.u32 4294901760, %v2201_v27  ;;  %614 = vmatpush.msra.mxu2 %v2185_v23  ;;  %358 = vmatpush.msra.mxu0 %v2169_v15  ;;  %v506_v38 = vsub.f32 %v2182_v22, %v505_v30  ;;  %v512_v39 = vsub.f32 %v2185_v23, %v511_v31  ;;  %v2229_v42 = vsub.f32 %v295_v32, %v2214_v34  ;;  %s1899_s26 = sshll.u32 (%p2138_p9), %s1710_s25, 3 }
  0x3a   : > { %v518_v40 = vsub.f32 %v2189_v24, %v517_v33  ;;  %721 = vmatpush.msra.mxu3 %v2169_v15  ;;  %v1169_v43 = vsub.f32 %v2204_v28, %v1168_v36  ;;  %v524_v48 = vsub.f32 %v2197_v25, %v523_v35  ;;  %v2252_v53 = vsub.f32 %v298_v41, %v2241_v49  ;;  %v268_v41 = vld [vmem:[%s2194_s6 + $0x38] sm:$0xff]  ;;  %s2904_s30 = scalar_lea.vmem (%p2138_p9), %s2998_s3, %s1899_s26 }
  0x3b   : > { %v507_v46 = vand.u32 4294901760, %v506_v38  ;;  %617 = vmatpush.msra.mxu2 %v2189_v24  ;;  %360 = vmatpush.msra.mxu0 %v2174_v19  ;;  %v513_v47 = vand.u32 4294901760, %v512_v39  ;;  %v2244_v50 = vand.u32 4294901760, %v2229_v42  ;;  %v530_v51 = vsub.f32 %v2201_v27, %v529_v37 }
  0x3c   : > { %723 = vmatpush.msra.mxu3 %v2174_v19  ;;  %v519_v52 = vand.u32 4294901760, %v518_v40  ;;  %v301_v54 = vsel %vm293_vm0, %v263_v44, 0  ;;  %v1170_v57 = vand.u32 4294901760, %v1169_v43  ;;  %v525_v59 = vand.u32 4294901760, %v524_v48 }
  0x3d   : > { %508 = vmatpush.msra.mxu1 %v507_v46  ;;  %620 = vmatpush.msra.mxu2 %v2197_v25  ;;  %v366_v56 = vsub.f32 %v2229_v42, %v2244_v50  ;;  %v2261_v58 = vand.u32 4294901760, %v301_v54  ;;  %v2265_v60 = vand.u32 4294901760, %v2252_v53  ;;  %v2268_v61 = vsub.f32 %v284_v45, %v2255_v55  ;;  %v282_v25 = vld [vmem:[%s2160_s27 + $0x28] sm:$0xff] }
  0x3e   : > { %362 = vmatpush.msra.mxu0 %v2176_v20  ;;  %725 = vmatpush.msra.mxu3 %v2176_v20  ;;  %v531_v0 = vand.u32 4294901760, %v530_v51  ;;  %v304_v4 = vsel %vm293_vm0, %v264_v63, 0  ;;  %v2348_v26 = vand.u32 4294901760, %v282_v25  ;;  %v316_v45 = vsel %vm293_vm0, %v268_v41, 0  ;;  %v269_v51 = vld [vmem:[%s2194_s6 + $0x40] sm:$0xff] }
  0x3f   : > { %514 = vmatpush.msra.mxu1 %v513_v47  ;;  %623 = vmatpush.msra.mxu2 %v2201_v27  ;;  %v2270_v62 = vand.u32 4294901760, %v366_v56  ;;  %v3000_v1 = vand.u32 4294901760, %v2268_v61  ;;  %v374_v2 = vsub.f32 %v2252_v53, %v2265_v60  ;;  %v2281_v3 = vsub.f32 %v301_v54, %v2261_v58  ;;  %v267_v27 = vld [vmem:[%s2194_s6 + $0x30] sm:$0xff] }
  0x40   : > { %626 = vmatmul.f32.vlgmr.msra.gmra.mxu2 %v2229_v42  ;;  %729 = vmatmul.f32.vlgmr.msra.gmra.mxu3 %v2244_v50  ;;  %v2294_v9 = vand.u32 4294901760, %v304_v4  ;;  %v2355_v29 = vsub.f32 %v282_v25, %v2348_v26  ;;  %v313_v32 = vsel %vm293_vm0, %v267_v27, 0  ;;  %v2394_v48 = vand.u32 4294901760, %v316_v45  ;;  %v271_v27 = vld [vmem:[%s2194_s6 + $0x50] sm:$0xff] }
  0x41   : > { %520 = vmatpush.msra.mxu1 %v519_v52  ;;  %1017 = vmatpush.msrb.mxu2 %v2178_v21  ;;  %v1175_v5 = vsub.f32 %v2268_v61, %v3000_v1  ;;  %v2289_v7 = vand.u32 4294901760, %v374_v2  ;;  %v2292_v8 = vand.u32 4294901760, %v2281_v3  ;;  %v2376_v39 = vand.u32 4294901760, %v313_v32 }
  0x42   : > { %368 = vmatmul.f32.vlgmr.msra.gmra.mxu0 %v2270_v62  ;;  %1171 = vmatpush.msrb.mxu3 %v1170_v57  ;;  %v2307_v12 = vsub.f32 %v304_v4, %v2294_v9  ;;  %v2403_v54 = vsub.f32 %v316_v45, %v2394_v48  ;;  %v319_v56 = vsel %vm293_vm0, %v269_v51, 0  ;;  %v270_v4 = vld [vmem:[%s2194_s6 + $0x48] sm:$0xff]  ;;  %v272_v51 = vld [vmem:[%s2194_s6 + $0x58] sm:$0xff] }
  0x43   : > { %526 = vmatpush.msra.mxu1 %v525_v59  ;;  %837 = vmatpush.msrb.mxu0 %v505_v30  ;;  %v1176_v6 = vand.u32 4294901760, %v1175_v5  ;;  %v382_v11 = vsub.f32 %v2281_v3, %v2292_v8  ;;  %v2385_v44 = vsub.f32 %v313_v32, %v2376_v39  ;;  %v2412_v63 = vand.u32 4294901760, %v319_v56 }
  0x44   : > { %1019 = vmatpush.msrb.mxu2 %v2255_v55  ;;  %v2320_v16 = vand.u32 4294901760, %v2307_v12  ;;  %v2410_v59 = vand.u32 4294901760, %v2403_v54 }
  0x45   : > { %532 = vmatpush.msra.mxu1 %v531_v0  ;;  %841 = vmatpush.msrb.mxu0 %v511_v31  ;;  %v2392_v47 = vand.u32 4294901760, %v2385_v44  ;;  %v280_v0 = vld [vmem:[%s2160_s27 + $0x18] sm:$0xff] }
  0x46   : > { %534 = vmatmul.f32.vlgmr.msra.gmra.mxu1 %v2214_v34  ;;  %1177 = vmatpush.msrb.mxu3 %v1176_v6  ;;  %v390_v18 = vsub.f32 %v2307_v12, %v2320_v16  ;;  %v2415_v2 = vand.u32 4294901760, %v280_v0  ;;  %v422_v5 = vsub.f32 %v2403_v54, %v2410_v59  ;;  %v2426_v6 = vsub.f32 %v319_v56, %v2412_v63 }
  0x47   : > { %931 = vmatpush.msrb.mxu1 %v2165_v13  ;;  %845 = vmatpush.msrb.mxu0 %v517_v33  ;;  %v307_v13 = vsel %vm293_vm0, %v265_v10, 0  ;;  %v2999_v33 = vand.u32 4294901760, %v2355_v29  ;;  %v414_v52 = vsub.f32 %v2385_v44, %v2392_v47 }
  0x48   : > { %631 = vmatmul.f32.gmra.mxu2 %v2252_v53  ;;  %735 = vmatmul.f32.gmra.mxu3 %v2265_v60  ;;  %v2322_v17 = vand.u32 4294901760, %v307_v13  ;;  %v2340_v22 = vand.u32 4294901760, %v390_v18  ;;  %v2429_v10 = vsub.f32 %v280_v0, %v2415_v2  ;;  %v2438_v18 = vand.u32 4294901760, %v2426_v6 }
  0x49   : > { %933 = vmatpush.msrb.mxu1 %v2167_v14  ;;  %849 = vmatpush.msrb.mxu0 %v523_v35  ;;  %v2317_v14 = vand.u32 4294901760, %v382_v11  ;;  %v1181_v35 = vsub.f32 %v2355_v29, %v2999_v33  ;;  %v2407_v57 = vand.u32 4294901760, %v414_v52  ;;  %v322_v11 = vsel %vm293_vm0, %v270_v4, 0 }
  0x4a   : > { %376 = vmatmul.f32.gmra.mxu0 %v2289_v7  ;;  %1021 = vmatpush.msrb.mxu2 %v2348_v26  ;;  %v430_v32 = vsub.f32 %v2426_v6, %v2438_v18  ;;  %v328_v0 = vsel %vm293_vm0, %v272_v51, 0 }
  0x4b   : > { %935 = vmatpush.msrb.mxu1 %v2169_v15  ;;  %853 = vmatpush.msrb.mxu0 %v529_v37  ;;  %v266_v15 = vld [vmem:[%s2194_s6 + $0x28] sm:$0xff]  ;;  %v1182_v40 = vand.u32 4294901760, %v1181_v35 }
  0x4c   : > { %1023 = vmatpush.msrb.mxu2 %v2415_v2  ;;  %v2454_v41 = vand.u32 4294901760, %v430_v32 }
  0x4d   : > { %937 = vmatpush.msrb.mxu1 %v2174_v19  ;;  %1274 = vmatpush.msra.mxu0 %v2204_v28  ;;  %v2335_v19 = vsub.f32 %v307_v13, %v2322_v17  ;;  %v1186_v13 = vand.u32 4294901760, %v2429_v10 }
  0x4e   : > { %538 = vmatmul.f32.gmra.mxu1 %v2241_v49  ;;  %1183 = vmatpush.msrb.mxu3 %v1182_v40  ;;  %v325_v40 = vsel %vm293_vm0, %v271_v27, 0 }
  0x4f   : > { %939 = vmatpush.msrb.mxu1 %v2176_v20  ;;  %1277 = vmatpush.msra.mxu0 %v2268_v61  ;;  %v310_v20 = vsel %vm293_vm0, %v266_v15, 0  ;;  %v2343_v23 = vand.u32 4294901760, %v2335_v19  ;;  %v2435_v15 = vand.u32 4294901760, %v422_v5  ;;  %v1187_v25 = vsub.f32 %v2429_v10, %v1186_v13 }
  0x50   : > { %636 = vmatmul.f32.gmra.mxu2 %v2281_v3  ;;  %741 = vmatmul.f32.gmra.mxu3 %v2292_v8  ;;  %v2345_v24 = vand.u32 4294901760, %v310_v20  ;;  %v2459_v45 = vand.u32 4294901760, %v325_v40 }
  0x51   : > { %1380 = vmatpush.msra.mxu1 %v2178_v21  ;;  %v398_v30 = vsub.f32 %v2335_v19, %v2343_v23  ;;  %1280 = vmatpush.msra.mxu0 %v2355_v29 }
  0x52   : > { %384 = vmatmul.f32.gmra.mxu0 %v2317_v14  ;;  %v2362_v31 = vsub.f32 %v310_v20, %v2345_v24  ;;  %v2440_v20 = vand.u32 4294901760, %v322_v11  ;;  %v2468_v56 = vsub.f32 %v325_v40, %v2459_v45 }
  0x53   : > { %1382 = vmatpush.msra.mxu1 %v2255_v55  ;;  %v2371_v37 = vand.u32 4294901760, %v398_v30  ;;  %1283 = vmatpush.msra.mxu0 %v2429_v10  ;;  %v1188_v30 = vand.u32 4294901760, %v1187_v25  ;;  %v2477_v10 = vand.u32 4294901760, %v328_v0 }
  0x54   : > { %v2374_v38 = vand.u32 4294901760, %v2362_v31  ;;  %v2450_v35 = vsub.f32 %v322_v11, %v2440_v20  ;;  %3019 = vst [vmem:[#allocation6_spill] sm:$0xff] %v2468_v56  ;;  %v2475_v5 = vand.u32 4294901760, %v2468_v56  ;;  %v273_v11 = vld [vmem:[%s2194_s6 + $0x60] sm:$0xff] }
  0x55   : > { %1384 = vmatpush.msra.mxu1 %v2348_v26  ;;  %1189 = vmatpush.msrb.mxu3 %v1188_v30  ;;  %v2486_v27 = vsub.f32 %v328_v0, %v2477_v10  ;;  %v278_v30 = vld [vmem:[%s2160_s27 + $0x8] sm:$0xff]  ;;  %v331_v32 = vsel %vm293_vm0, %v273_v11, 0 }
  0x56   : > { %542 = vmatmul.f32.gmra.mxu1 %v2261_v58  ;;  %v406_v43 = vsub.f32 %v2362_v31, %v2374_v38  ;;  %3017 = vst [vmem:[#allocation4_spill] sm:$0xff] %v2450_v35  ;;  %v446_v25 = vsub.f32 %v2468_v56, %v2475_v5  ;;  %v1024_v40 = vand.u32 4294901760, %v278_v30  ;;  %v2496_v1 = vand.u32 4294901760, %v331_v32  ;;  %v274_v11 = vld [vmem:[%s2194_s6 + $0x68] sm:$0xff] }
  0x57   : > { %1386 = vmatpush.msra.mxu1 %v2415_v2  ;;  %3020 = vst [vmem:[#allocation7_spill] sm:$0xff] %v2475_v5  ;;  %v2494_v33 = vand.u32 4294901760, %v2486_v27 }
  0x58   : > { %641 = vmatmul.f32.gmra.mxu2 %v2307_v12  ;;  %747 = vmatmul.f32.gmra.mxu3 %v2320_v16  ;;  %v2389_v46 = vand.u32 4294901760, %v406_v43  ;;  %v2457_v43 = vand.u32 4294901760, %v2450_v35  ;;  %3021 = vst [vmem:[#allocation8_spill] sm:$0xff] %v2486_v27  ;;  %v1191_v51 = vsub.f32 %v278_v30, %v1024_v40  ;;  %v2509_v28 = vsub.f32 %v331_v32, %v2496_v1 }
  0x59   : > { %1025 = vmatpush.msrb.mxu2 %v1024_v40  ;;  %1388 = vmatpush.msra.mxu1 %v1024_v40  ;;  %3022 = vst [vmem:[#allocation9_spill] sm:$0xff] %v2494_v33 }
  0x5a   : > { %392 = vmatmul.f32.gmra.mxu0 %v2340_v22  ;;  %3018 = vst [vmem:[#allocation5_spill] sm:$0xff] %v2457_v43  ;;  %v438_v52 = vsub.f32 %v2450_v35, %v2457_v43  ;;  %v1192_v0 = vand.u32 4294901760, %v1191_v51 }
  0x5b   : > { %1500 = vmatpush.msra.mxu2 %v1168_v36  ;;  %1286 = vmatpush.msra.mxu0 %v1191_v51  ;;  %3024 = vst [vmem:[#allocation10_spill] sm:$0xff] %v2509_v28  ;;  %v334_v36 = vsel %vm293_vm0, %v274_v11, 0 }
  0x5c   : > { %v2472_v4 = vand.u32 4294901760, %v438_v52  ;;  %v2491_v52 = vand.u32 4294901760, %v446_v25  ;;  %v1193_v30 = vsub.f32 %v1191_v51, %v1192_v0  ;;  %v454_v25 = vsub.f32 %v2486_v27, %v2494_v33 }
  0x5d   : > { %v2520_v51 = vand.u32 4294901760, %v334_v36 }
  0x5e   : > { %546 = vmatmul.f32.gmra.mxu1 %v2294_v9 }
  0x60   : > { %646 = vmatmul.f32.gmra.mxu2 %v2335_v19  ;;  %753 = vmatmul.f32.gmra.mxu3 %v2343_v23 }
  0x62   : > { %400 = vmatmul.f32.gmra.mxu0 %v2371_v37 }
  0x66   : > { %550 = vmatmul.f32.gmra.mxu1 %v2322_v17 }
  0x68   : > { %651 = vmatmul.f32.gmra.mxu2 %v2362_v31  ;;  %759 = vmatmul.f32.gmra.mxu3 %v2374_v38 }
  0x6a   : > { %408 = vmatmul.f32.gmra.mxu0 %v2389_v46 }
  0x6e   : > { %554 = vmatmul.f32.gmra.mxu1 %v2345_v24 }
  0x70   : > { %656 = vmatmul.f32.gmra.mxu2 %v2385_v44  ;;  %765 = vmatmul.f32.gmra.mxu3 %v2392_v47 }
  0x72   : > { %416 = vmatmul.f32.gmra.mxu0 %v2407_v57 }
  0x76   : > { %558 = vmatmul.f32.gmra.mxu1 %v2376_v39 }
  0x78   : > { %661 = vmatmul.f32.gmra.mxu2 %v2403_v54  ;;  %771 = vmatmul.f32.gmra.mxu3 %v2410_v59 }
  0x7a   : > { %424 = vmatmul.f32.gmra.mxu0 %v2435_v15 }
  0x7e   : > { %562 = vmatmul.f32.gmra.mxu1 %v2394_v48 }
  0x80   : > { %666 = vmatmul.f32.gmra.mxu2 %v2426_v6  ;;  %777 = vmatmul.f32.gmra.mxu3 %v2438_v18 }
  0x82   : > { %432 = vmatmul.f32.gmra.mxu0 %v2454_v41 }
  0x86   : > { %566 = vmatmul.f32.gmra.mxu1 %v2412_v63 }
  0x88   : > { %671 = vmatmul.f32.gmra.mxu2 %v2450_v35  ;;  %783 = vmatmul.f32.gmra.mxu3 %v2457_v43  ;;  %v3023_v43 = vand.u32 4294901760, %v2268_v61  ;;  %v1194_v35 = vand.u32 4294901760, %v1193_v30  ;;  %v2515_v61 = vand.u32 4294901760, %v454_v25 }
  0x8a   : > { %440 = vmatmul.f32.gmra.mxu0 %v2472_v4  ;;  %1504 = vmatpush.msra.mxu2 %v3023_v43  ;;  %v2518_v43 = vand.u32 4294901760, %v2509_v28 }
  0x8b   : > { %1195 = vmatpush.msrb.mxu3 %v1194_v35  ;;  %v2531_v35 = vsub.f32 %v334_v36, %v2520_v51 }
  0x8c   : > { %3026 = vst [vmem:[#allocation11_spill] sm:$0xff] %v2518_v43 }
  0x8d   : > { %1594 = vmatpush.msra.mxu3 %v2178_v21  ;;  %3027 = vst [vmem:[#allocation12_spill] sm:$0xff] %v2531_v35 }
  0x8e   : > { %570 = vmatmul.f32.gmra.mxu1 %v2440_v20 }
  0x8f   : > { %1596 = vmatpush.msra.mxu3 %v2255_v55  ;;  %v2540_v55 = vand.u32 4294901760, %v2531_v35 }
  0x90   : > { %676 = vmatmul.f32.gmra.mxu2 %v2468_v56  ;;  %789 = vmatmul.f32.gmra.mxu3 %v2475_v5  ;;  %v3025_v56 = vand.u32 4294901760, %v2355_v29  ;;  %v275_v29 = vld [vmem:[%s2194_s6 + $0x70] sm:$0xff] }
  0x91   : > { %1598 = vmatpush.msra.mxu3 %v2348_v26  ;;  %3028 = vst [vmem:[#allocation13_spill] sm:$0xff] %v2540_v55  ;;  %v470_v26 = vsub.f32 %v2531_v35, %v2540_v55 }
  0x92   : > { %448 = vmatmul.f32.gmra.mxu0 %v2491_v52  ;;  %1508 = vmatpush.msra.mxu2 %v3025_v56  ;;  %v337_v56 = vsel %vm293_vm0, %v275_v29, 0 }
  0x93   : > { %1600 = vmatpush.msra.mxu3 %v2415_v2  ;;  %v2542_v32 = vand.u32 4294901760, %v337_v56  ;;  %v2555_v30 = vand.u32 4294901760, %v470_v26 }
  0x94   : > { %1512 = vmatpush.msra.mxu2 %v1186_v13  ;;  %v462_v13 = vsub.f32 %v2509_v28, %v2518_v43 }
  0x95   : > { %1602 = vmatpush.msra.mxu3 %v1024_v40  ;;  %v2551_v2 = vsub.f32 %v337_v56, %v2542_v32 }
  0x96   : > { %574 = vmatmul.f32.gmra.mxu1 %v2459_v45  ;;  %1516 = vmatpush.msra.mxu2 %v1192_v0  ;;  %v2537_v21 = vand.u32 4294901760, %v462_v13  ;;  %v276_v0 = vld [vmem:[%s2194_s6 + $0x78] sm:$0xff] }
  0x97   : > { %3029 = vst [vmem:[#allocation14_spill] sm:$0xff] %v2551_v2  ;;  %v340_v11 = vsel %vm293_vm0, %v276_v0, 0  ;;  %v2558_v40 = vand.u32 4294901760, %v2551_v2 }
  0x98   : > { %681 = vmatmul.f32.gmra.mxu2 %v2486_v27  ;;  %795 = vmatmul.f32.gmra.mxu3 %v2494_v33  ;;  %v2560_v25 = vand.u32 4294901760, %v340_v11 }
  0x99   : > { %3030 = vst [vmem:[#allocation15_spill] sm:$0xff] %v2558_v40  ;;  %v478_v36 = vsub.f32 %v2551_v2, %v2558_v40 }
  0x9a   : > { %456 = vmatmul.f32.gmra.mxu0 %v2515_v61  ;;  %v2568_v29 = vsub.f32 %v340_v11, %v2560_v25  ;;  %v2594_v11 = vld [vmem:[%s257_s10] sm:$0x3] }
  0x9b   : > { %v2574_v13 = vand.u32 4294901760, %v478_v36  ;;  %v2598_v36 = vperm.slane %v2594_v11, 0 }
  0x9c   : > { %3031 = vst [vmem:[#allocation16_spill] sm:$0xff] %v2568_v29  ;;  %v2577_v56 = vand.u32 4294901760, %v2568_v29 }
  0x9e   : > { %578 = vmatmul.f32.gmra.mxu1 %v2477_v10  ;;  %3032 = vst [vmem:[#allocation17_spill] sm:$0xff] %v2577_v56  ;;  %v486_v0 = vsub.f32 %v2568_v29, %v2577_v56 }
  0xa0   : > { %686 = vmatmul.f32.gmra.mxu2 %v2509_v28  ;;  %801 = vmatmul.f32.gmra.mxu3 %v2518_v43  ;;  %v2587_v26 = vand.u32 4294901760, %v486_v0 }
  0xa2   : > { %464 = vmatmul.f32.gmra.mxu0 %v2537_v21 }
  0xa6   : > { %582 = vmatmul.f32.gmra.mxu1 %v2496_v1 }
  0xa8   : > { %691 = vmatmul.f32.gmra.mxu2 %v2531_v35  ;;  %807 = vmatmul.f32.gmra.mxu3 %v2540_v55 }
  0xaa   : > { %472 = vmatmul.f32.gmra.mxu0 %v2555_v30 }
  0xae   : > { %586 = vmatmul.f32.gmra.mxu1 %v2520_v51 }
  0xb0   : > { %696 = vmatmul.f32.gmra.mxu2 %v2551_v2  ;;  %813 = vmatmul.f32.gmra.mxu3 %v2558_v40 }
  0xb2   : > { %480 = vmatmul.f32.gmra.mxu0 %v2574_v13 }
  0xb6   : > { %590 = vmatmul.f32.gmra.mxu1 %v2542_v32 }
  0xb8   : > { %701 = vmatmul.f32.gmra.mxu2 %v2568_v29  ;;  %819 = vmatmul.f32.gmra.mxu3 %v2577_v56 }
  0xba   : > { %488 = vmatmul.f32.gmra.mxu0 %v2587_v26 }
  0xbe   : > { %594 = vmatmul.f32.gmra.mxu1 %v2560_v25 }
  0xbf   : > { %v369_v40 = vpop.f32.mrf.mxu0 }
  0xc0   : > { %v370_v0 = vadd.f32 %v369_v40, %v2598_v36  ;;  %1031 = vmatmul.f32.vlgmr.msrb.gmra.mxu2 %v2270_v62  ;;  %1197 = vmatmul.f32.vlgmr.msrb.gmra.mxu3 %v2214_v34 }
  0xc2   : > { %855 = vmatmul.f32.vlgmr.msrb.gmra.mxu0 %v2214_v34 }
  0xc3   : > { %v535_v29 = vpop.f32.mrf.mxu1  ;;  %v627_v56 = vpop.f32.mrf.mxu2 }
  0xc4   : > { %v536_v2 = vadd.f32 %v535_v29, %v370_v0  ;;  %v730_v55 = vpop.f32.mrf.mxu3 }
  0xc6   : > { %v628_v35 = vadd.f32 %v627_v56, %v536_v2  ;;  %941 = vmatmul.f32.vlgmr.msrb.gmra.mxu1 %v2214_v34 }
  0xc7   : > { %v377_v43 = vpop.f32.mrf.mxu0 }
  0xc8   : > { %v378_v28 = vadd.f32 %v377_v43, %v2598_v36  ;;  %v2607_v33 = vadd.f32 %v730_v55, %v628_v35  ;;  %1039 = vmatmul.f32.gmra.mxu2 %v2289_v7  ;;  %1201 = vmatmul.f32.gmra.mxu3 %v2241_v49 }
  0xca   : > { %859 = vmatmul.f32.gmra.mxu0 %v2241_v49 }
  0xcb   : > { %v539_v62 = vpop.f32.mrf.mxu1  ;;  %v632_v40 = vpop.f32.mrf.mxu2 }
  0xcc   : > { %v540_v27 = vadd.f32 %v539_v62, %v378_v28  ;;  %v736_v5 = vpop.f32.mrf.mxu3 }
  0xce   : > { %v633_v29 = vadd.f32 %v632_v40, %v540_v27  ;;  %945 = vmatmul.f32.gmra.mxu1 %v2241_v49 }
  0xcf   : > { %v385_v2 = vpop.f32.mrf.mxu0 }
  0xd0   : > { %v386_v56 = vadd.f32 %v385_v2, %v2598_v36  ;;  %v2614_v0 = vadd.f32 %v736_v5, %v633_v29  ;;  %1047 = vmatmul.f32.gmra.mxu2 %v2317_v14  ;;  %1205 = vmatmul.f32.gmra.mxu3 %v2261_v58 }
  0xd2   : > { %863 = vmatmul.f32.gmra.mxu0 %v2261_v58 }
  0xd3   : > { %v543_v7 = vpop.f32.mrf.mxu1  ;;  %v637_v43 = vpop.f32.mrf.mxu2 }
  0xd4   : > { %v544_v35 = vadd.f32 %v543_v7, %v386_v56  ;;  %v742_v55 = vpop.f32.mrf.mxu3 }
  0xd6   : > { %v638_v28 = vadd.f32 %v637_v43, %v544_v35  ;;  %949 = vmatmul.f32.gmra.mxu1 %v2261_v58 }
  0xd7   : > { %v393_v27 = vpop.f32.mrf.mxu0 }
  0xd8   : > { %v394_v62 = vadd.f32 %v393_v27, %v2598_v36  ;;  %v2621_v40 = vadd.f32 %v742_v55, %v638_v28  ;;  %1055 = vmatmul.f32.gmra.mxu2 %v2340_v22  ;;  %1209 = vmatmul.f32.gmra.mxu3 %v2294_v9 }
  0xda   : > { %867 = vmatmul.f32.gmra.mxu0 %v2294_v9 }
  0xdb   : > { %v547_v14 = vpop.f32.mrf.mxu1  ;;  %v642_v5 = vpop.f32.mrf.mxu2 }
  0xdc   : > { %v548_v29 = vadd.f32 %v547_v14, %v394_v62  ;;  %v748_v2 = vpop.f32.mrf.mxu3 }
  0xde   : > { %v643_v56 = vadd.f32 %v642_v5, %v548_v29  ;;  %953 = vmatmul.f32.gmra.mxu1 %v2294_v9 }
  0xdf   : > { %v401_v7 = vpop.f32.mrf.mxu0 }
  0xe0   : > { %v402_v43 = vadd.f32 %v401_v7, %v2598_v36  ;;  %v2628_v35 = vadd.f32 %v748_v2, %v643_v56  ;;  %1063 = vmatmul.f32.gmra.mxu2 %v2371_v37  ;;  %1213 = vmatmul.f32.gmra.mxu3 %v2322_v17 }
  0xe2   : > { %871 = vmatmul.f32.gmra.mxu0 %v2322_v17 }
  0xe3   : > { %v551_v22 = vpop.f32.mrf.mxu1  ;;  %v647_v55 = vpop.f32.mrf.mxu2 }
  0xe4   : > { %v552_v28 = vadd.f32 %v551_v22, %v402_v43  ;;  %v754_v27 = vpop.f32.mrf.mxu3 }
  0xe6   : > { %v648_v62 = vadd.f32 %v647_v55, %v552_v28  ;;  %957 = vmatmul.f32.gmra.mxu1 %v2322_v17 }
  0xe7   : > { %v409_v14 = vpop.f32.mrf.mxu0 }
  0xe8   : > { %v410_v5 = vadd.f32 %v409_v14, %v2598_v36  ;;  %v2635_v29 = vadd.f32 %v754_v27, %v648_v62  ;;  %1071 = vmatmul.f32.gmra.mxu2 %v2389_v46  ;;  %1217 = vmatmul.f32.gmra.mxu3 %v2345_v24 }
  0xea   : > { %875 = vmatmul.f32.gmra.mxu0 %v2345_v24 }
  0xeb   : > { %v555_v37 = vpop.f32.mrf.mxu1  ;;  %v652_v2 = vpop.f32.mrf.mxu2 }
  0xec   : > { %v556_v56 = vadd.f32 %v555_v37, %v410_v5  ;;  %v760_v7 = vpop.f32.mrf.mxu3 }
  0xee   : > { %v653_v43 = vadd.f32 %v652_v2, %v556_v56  ;;  %961 = vmatmul.f32.gmra.mxu1 %v2345_v24 }
  0xef   : > { %v417_v22 = vpop.f32.mrf.mxu0 }
  0xf0   : > { %v418_v55 = vadd.f32 %v417_v22, %v2598_v36  ;;  %v2642_v28 = vadd.f32 %v760_v7, %v653_v43  ;;  %1079 = vmatmul.f32.gmra.mxu2 %v2407_v57  ;;  %1221 = vmatmul.f32.gmra.mxu3 %v2376_v39 }
  0xf2   : > { %879 = vmatmul.f32.gmra.mxu0 %v2376_v39 }
  0xf3   : > { %v559_v46 = vpop.f32.mrf.mxu1  ;;  %v657_v27 = vpop.f32.mrf.mxu2 }
  0xf4   : > { %v560_v62 = vadd.f32 %v559_v46, %v418_v55  ;;  %v766_v14 = vpop.f32.mrf.mxu3 }
  0xf6   : > { %v658_v5 = vadd.f32 %v657_v27, %v560_v62  ;;  %965 = vmatmul.f32.gmra.mxu1 %v2376_v39 }
  0xf7   : > { %v425_v37 = vpop.f32.mrf.mxu0 }
  0xf8   : > { %v426_v2 = vadd.f32 %v425_v37, %v2598_v36  ;;  %v2649_v56 = vadd.f32 %v766_v14, %v658_v5  ;;  %1087 = vmatmul.f32.gmra.mxu2 %v2435_v15  ;;  %1225 = vmatmul.f32.gmra.mxu3 %v2394_v48 }
  0xfa   : > { %883 = vmatmul.f32.gmra.mxu0 %v2394_v48 }
  0xfb   : > { %v563_v57 = vpop.f32.mrf.mxu1  ;;  %v662_v7 = vpop.f32.mrf.mxu2 }
  0xfc   : > { %v564_v43 = vadd.f32 %v563_v57, %v426_v2  ;;  %v772_v22 = vpop.f32.mrf.mxu3 }
  0xfe   : > { %v663_v55 = vadd.f32 %v662_v7, %v564_v43  ;;  %969 = vmatmul.f32.gmra.mxu1 %v2394_v48 }
  0xff   : > { %v433_v46 = vpop.f32.mrf.mxu0 }
 0x100   : > { %v434_v27 = vadd.f32 %v433_v46, %v2598_v36  ;;  %v2656_v62 = vadd.f32 %v772_v22, %v663_v55  ;;  %1095 = vmatmul.f32.gmra.mxu2 %v2454_v41  ;;  %1229 = vmatmul.f32.gmra.mxu3 %v2412_v63 }
 0x102   : > { %887 = vmatmul.f32.gmra.mxu0 %v2412_v63 }
 0x103   : > { %v567_v15 = vpop.f32.mrf.mxu1  ;;  %v667_v14 = vpop.f32.mrf.mxu2 }
 0x104   : > { %v568_v5 = vadd.f32 %v567_v15, %v434_v27  ;;  %v778_v37 = vpop.f32.mrf.mxu3 }
 0x106   : > { %v668_v2 = vadd.f32 %v667_v14, %v568_v5  ;;  %973 = vmatmul.f32.gmra.mxu1 %v2412_v63 }
 0x107   : > { %v441_v57 = vpop.f32.mrf.mxu0 }
 0x108   : > { %v442_v7 = vadd.f32 %v441_v57, %v2598_v36  ;;  %v2663_v43 = vadd.f32 %v778_v37, %v668_v2  ;;  %1103 = vmatmul.f32.gmra.mxu2 %v2472_v4  ;;  %1233 = vmatmul.f32.gmra.mxu3 %v2440_v20 }
 0x10a   : > { %891 = vmatmul.f32.gmra.mxu0 %v2440_v20 }
 0x10b   : > { %v571_v41 = vpop.f32.mrf.mxu1  ;;  %v672_v22 = vpop.f32.mrf.mxu2 }
 0x10c   : > { %v572_v55 = vadd.f32 %v571_v41, %v442_v7  ;;  %v784_v46 = vpop.f32.mrf.mxu3 }
 0x10e   : > { %v673_v27 = vadd.f32 %v672_v22, %v572_v55  ;;  %977 = vmatmul.f32.gmra.mxu1 %v2440_v20 }
 0x10f   : > { %v449_v15 = vpop.f32.mrf.mxu0 }
 0x110   : > { %v450_v14 = vadd.f32 %v449_v15, %v2598_v36  ;;  %v2670_v5 = vadd.f32 %v784_v46, %v673_v27  ;;  %1111 = vmatmul.f32.gmra.mxu2 %v2491_v52  ;;  %1237 = vmatmul.f32.gmra.mxu3 %v2459_v45 }
 0x112   : > { %895 = vmatmul.f32.gmra.mxu0 %v2459_v45 }
 0x113   : > { %v575_v4 = vpop.f32.mrf.mxu1  ;;  %v677_v37 = vpop.f32.mrf.mxu2 }
 0x114   : > { %v576_v2 = vadd.f32 %v575_v4, %v450_v14  ;;  %v790_v57 = vpop.f32.mrf.mxu3 }
 0x116   : > { %v678_v7 = vadd.f32 %v677_v37, %v576_v2  ;;  %981 = vmatmul.f32.gmra.mxu1 %v2459_v45 }
 0x117   : > { %v457_v41 = vpop.f32.mrf.mxu0 }
 0x118   : > { %v458_v22 = vadd.f32 %v457_v41, %v2598_v36  ;;  %v2677_v55 = vadd.f32 %v790_v57, %v678_v7  ;;  %1119 = vmatmul.f32.gmra.mxu2 %v2515_v61  ;;  %1241 = vmatmul.f32.gmra.mxu3 %v2477_v10 }
 0x11a   : > { %899 = vmatmul.f32.gmra.mxu0 %v2477_v10 }
 0x11b   : > { %v579_v52 = vpop.f32.mrf.mxu1  ;;  %v682_v46 = vpop.f32.mrf.mxu2 }
 0x11c   : > { %v580_v27 = vadd.f32 %v579_v52, %v458_v22  ;;  %v796_v15 = vpop.f32.mrf.mxu3 }
 0x11e   : > { %v683_v14 = vadd.f32 %v682_v46, %v580_v27  ;;  %985 = vmatmul.f32.gmra.mxu1 %v2477_v10 }
 0x11f   : > { %v465_v4 = vpop.f32.mrf.mxu0 }
 0x120   : > { %v466_v37 = vadd.f32 %v465_v4, %v2598_v36  ;;  %v2684_v2 = vadd.f32 %v796_v15, %v683_v14  ;;  %1127 = vmatmul.f32.gmra.mxu2 %v2537_v21  ;;  %1245 = vmatmul.f32.gmra.mxu3 %v2496_v1 }
 0x122   : > { %903 = vmatmul.f32.gmra.mxu0 %v2496_v1 }
 0x123   : > { %v583_v61 = vpop.f32.mrf.mxu1  ;;  %v687_v57 = vpop.f32.mrf.mxu2 }
 0x124   : > { %v584_v7 = vadd.f32 %v583_v61, %v466_v37  ;;  %v802_v41 = vpop.f32.mrf.mxu3 }
 0x126   : > { %v688_v22 = vadd.f32 %v687_v57, %v584_v7  ;;  %989 = vmatmul.f32.gmra.mxu1 %v2496_v1 }
 0x127   : > { %v473_v52 = vpop.f32.mrf.mxu0 }
 0x128   : > { %v474_v46 = vadd.f32 %v473_v52, %v2598_v36  ;;  %v2691_v27 = vadd.f32 %v802_v41, %v688_v22  ;;  %1135 = vmatmul.f32.gmra.mxu2 %v2555_v30  ;;  %1249 = vmatmul.f32.gmra.mxu3 %v2520_v51 }
 0x12a   : > { %907 = vmatmul.f32.gmra.mxu0 %v2520_v51 }
 0x12b   : > { %v587_v21 = vpop.f32.mrf.mxu1  ;;  %v692_v15 = vpop.f32.mrf.mxu2 }
 0x12c   : > { %v588_v14 = vadd.f32 %v587_v21, %v474_v46  ;;  %v808_v4 = vpop.f32.mrf.mxu3 }
 0x12e   : > { %v693_v37 = vadd.f32 %v692_v15, %v588_v14  ;;  %993 = vmatmul.f32.gmra.mxu1 %v2520_v51 }
 0x12f   : > { %v481_v61 = vpop.f32.mrf.mxu0 }
 0x130   : > { %v482_v57 = vadd.f32 %v481_v61, %v2598_v36  ;;  %v2698_v7 = vadd.f32 %v808_v4, %v693_v37  ;;  %1143 = vmatmul.f32.gmra.mxu2 %v2574_v13  ;;  %1253 = vmatmul.f32.gmra.mxu3 %v2542_v32 }
 0x132   : > { %911 = vmatmul.f32.gmra.mxu0 %v2542_v32 }
 0x133   : > { %v591_v30 = vpop.f32.mrf.mxu1  ;;  %v697_v41 = vpop.f32.mrf.mxu2 }
 0x134   : > { %v592_v22 = vadd.f32 %v591_v30, %v482_v57  ;;  %v814_v52 = vpop.f32.mrf.mxu3 }
 0x136   : > { %v698_v46 = vadd.f32 %v697_v41, %v592_v22  ;;  %997 = vmatmul.f32.gmra.mxu1 %v2542_v32 }
 0x137   : > { %v489_v21 = vpop.f32.mrf.mxu0 }
 0x138   : > { %v490_v15 = vadd.f32 %v489_v21, %v2598_v36  ;;  %v2705_v14 = vadd.f32 %v814_v52, %v698_v46  ;;  %1151 = vmatmul.f32.gmra.mxu2 %v2587_v26  ;;  %1257 = vmatmul.f32.gmra.mxu3 %v2560_v25  ;;  %v2717_v26 = vperm.slane %v2594_v11, 1 }
 0x13a   : > { %915 = vmatmul.f32.gmra.mxu0 %v2560_v25 }
 0x13b   : > { %v595_v13 = vpop.f32.mrf.mxu1  ;;  %v702_v4 = vpop.f32.mrf.mxu2 }
 0x13c   : > { %v596_v37 = vadd.f32 %v595_v13, %v490_v15  ;;  %v820_v61 = vpop.f32.mrf.mxu3 }
 0x13e   : > { %v703_v57 = vadd.f32 %v702_v4, %v596_v37  ;;  %1001 = vmatmul.f32.gmra.mxu1 %v2560_v25 }
 0x13f   : > { %v856_v30 = vpop.f32.mrf.mxu0 }
 0x140   : > { %v2712_v41 = vadd.f32 %v820_v61, %v703_v57  ;;  %1518 = vmatmul.f32.vlgmr.msra.gmra.mxu2 %v2214_v34  ;;  %1604 = vmatmul.f32.vlgmr.msra.gmra.mxu3 %v2214_v34  ;;  %v857_v36 = vadd.f32 %v856_v30, %v2607_v33 }
 0x142   : > { %1289 = vmatmul.f32.vlgmr.msra.gmra.mxu0 %v2229_v42 }
 0x143   : > { %v942_v22 = vpop.f32.mrf.mxu1  ;;  %v1032_v52 = vpop.f32.mrf.mxu2 }
 0x144   : > { %v943_v46 = vadd.f32 %v942_v22, %v857_v36  ;;  %v1033_v21 = vadd.f32 %v1032_v52, %v2717_v26  ;;  %v1198_v15 = vpop.f32.mrf.mxu3 }
 0x146   : > { %1668 = vst [vmem:[%s2722_s12] sm:$0xff] %v943_v46  ;;  %1392 = vmatmul.f32.vlgmr.msra.gmra.mxu1 %v2244_v50  ;;  %v2726_v34 = vadd.f32 %v1198_v15, %v1033_v21 }
 0x147   : > { %v860_v11 = vpop.f32.mrf.mxu0 }
 0x148   : > { %1522 = vmatmul.f32.gmra.mxu2 %v2241_v49  ;;  %1608 = vmatmul.f32.gmra.mxu3 %v2241_v49  ;;  %v861_v42 = vadd.f32 %v860_v11, %v2614_v0 }
 0x14a   : > { %1294 = vmatmul.f32.gmra.mxu0 %v2252_v53 }
 0x14b   : > { %v946_v33 = vpop.f32.mrf.mxu1  ;;  %v1040_v13 = vpop.f32.mrf.mxu2 }
 0x14c   : > { %v947_v4 = vadd.f32 %v946_v33, %v861_v42  ;;  %v1041_v37 = vadd.f32 %v1040_v13, %v2717_v26  ;;  %v1202_v61 = vpop.f32.mrf.mxu3 }
 0x14e   : > { %1670 = vst [vmem:[%s2722_s12 + $0x10] sm:$0xff] %v947_v4  ;;  %1398 = vmatmul.f32.gmra.mxu1 %v2265_v60  ;;  %v2735_v50 = vadd.f32 %v1202_v61, %v1041_v37 }
 0x14f   : > { %v864_v57 = vpop.f32.mrf.mxu0 }
 0x150   : > { %1526 = vmatmul.f32.gmra.mxu2 %v2261_v58  ;;  %1612 = vmatmul.f32.gmra.mxu3 %v2261_v58  ;;  %v865_v49 = vadd.f32 %v864_v57, %v2621_v40 }
 0x152   : > { %1299 = vmatmul.f32.gmra.mxu0 %v2281_v3 }
 0x153   : > { %v950_v53 = vpop.f32.mrf.mxu1  ;;  %v1048_v0 = vpop.f32.mrf.mxu2 }
 0x154   : > { %v951_v30 = vadd.f32 %v950_v53, %v865_v49  ;;  %v1049_v36 = vadd.f32 %v1048_v0, %v2717_v26  ;;  %v1206_v22 = vpop.f32.mrf.mxu3 }
 0x156   : > { %1672 = vst [vmem:[%s2722_s12 + $0x20] sm:$0xff] %v951_v30  ;;  %1404 = vmatmul.f32.gmra.mxu1 %v2292_v8  ;;  %v2744_v60 = vadd.f32 %v1206_v22, %v1049_v36 }
 0x157   : > { %v868_v52 = vpop.f32.mrf.mxu0 }
 0x158   : > { %1530 = vmatmul.f32.gmra.mxu2 %v2294_v9  ;;  %1616 = vmatmul.f32.gmra.mxu3 %v2294_v9  ;;  %v869_v58 = vadd.f32 %v868_v52, %v2628_v35 }
 0x15a   : > { %1304 = vmatmul.f32.gmra.mxu0 %v2307_v12 }
 0x15b   : > { %v954_v3 = vpop.f32.mrf.mxu1  ;;  %v1056_v40 = vpop.f32.mrf.mxu2 }
 0x15c   : > { %v955_v46 = vadd.f32 %v954_v3, %v869_v58  ;;  %v1057_v21 = vadd.f32 %v1056_v40, %v2717_v26  ;;  %v1210_v15 = vpop.f32.mrf.mxu3 }
 0x15e   : > { %1674 = vst [vmem:[%s2722_s12 + $0x30] sm:$0xff] %v955_v46  ;;  %1410 = vmatmul.f32.gmra.mxu1 %v2320_v16  ;;  %v2753_v8 = vadd.f32 %v1210_v15, %v1057_v21 }
 0x15f   : > { %v872_v11 = vpop.f32.mrf.mxu0 }
 0x160   : > { %1534 = vmatmul.f32.gmra.mxu2 %v2322_v17  ;;  %1620 = vmatmul.f32.gmra.mxu3 %v2322_v17  ;;  %v873_v9 = vadd.f32 %v872_v11, %v2635_v29 }
 0x162   : > { %1309 = vmatmul.f32.gmra.mxu0 %v2335_v19 }
 0x163   : > { %v958_v12 = vpop.f32.mrf.mxu1  ;;  %v1064_v35 = vpop.f32.mrf.mxu2 }
 0x164   : > { %v959_v42 = vadd.f32 %v958_v12, %v873_v9  ;;  %v1065_v33 = vadd.f32 %v1064_v35, %v2717_v26  ;;  %v1214_v13 = vpop.f32.mrf.mxu3 }
 0x166   : > { %1676 = vst [vmem:[%s2722_s12 + $0x40] sm:$0xff] %v959_v42  ;;  %1416 = vmatmul.f32.gmra.mxu1 %v2343_v23  ;;  %v2762_v16 = vadd.f32 %v1214_v13, %v1065_v33 }
 0x167   : > { %v876_v4 = vpop.f32.mrf.mxu0 }
 0x168   : > { %1538 = vmatmul.f32.gmra.mxu2 %v2345_v24  ;;  %1624 = vmatmul.f32.gmra.mxu3 %v2345_v24  ;;  %v877_v17 = vadd.f32 %v876_v4, %v2642_v28 }
 0x16a   : > { %1314 = vmatmul.f32.gmra.mxu0 %v2362_v31 }
 0x16b   : > { %v962_v19 = vpop.f32.mrf.mxu1  ;;  %v1072_v29 = vpop.f32.mrf.mxu2 }
 0x16c   : > { %v963_v37 = vadd.f32 %v962_v19, %v877_v17  ;;  %v1073_v61 = vadd.f32 %v1072_v29, %v2717_v26  ;;  %v1218_v57 = vpop.f32.mrf.mxu3 }
 0x16e   : > { %1678 = vst [vmem:[%s2722_s12 + $0x50] sm:$0xff] %v963_v37  ;;  %1422 = vmatmul.f32.gmra.mxu1 %v2374_v38  ;;  %v2771_v23 = vadd.f32 %v1218_v57, %v1073_v61  ;;  %v3036_v37 = vld [vmem:[#allocation7_spill] sm:$0xff] }
 0x16f   : > { %v880_v49 = vpop.f32.mrf.mxu0 }
 0x170   : > { %1542 = vmatmul.f32.gmra.mxu2 %v2376_v39  ;;  %1628 = vmatmul.f32.gmra.mxu3 %v2376_v39  ;;  %v881_v24 = vadd.f32 %v880_v49, %v2649_v56 }
 0x172   : > { %1319 = vmatmul.f32.gmra.mxu0 %v2385_v44 }
 0x173   : > { %v966_v31 = vpop.f32.mrf.mxu1  ;;  %v1080_v28 = vpop.f32.mrf.mxu2 }
 0x174   : > { %v967_v53 = vadd.f32 %v966_v31, %v881_v24  ;;  %v1081_v0 = vadd.f32 %v1080_v28, %v2717_v26  ;;  %v1222_v30 = vpop.f32.mrf.mxu3 }
 0x176   : > { %1680 = vst [vmem:[%s2722_s12 + $0x60] sm:$0xff] %v967_v53  ;;  %1428 = vmatmul.f32.gmra.mxu1 %v2392_v47  ;;  %v2780_v38 = vadd.f32 %v1222_v30, %v1081_v0  ;;  %v3038_v0 = vld [vmem:[#allocation9_spill] sm:$0xff] }
 0x177   : > { %v884_v36 = vpop.f32.mrf.mxu0 }
 0x178   : > { %1546 = vmatmul.f32.gmra.mxu2 %v2394_v48  ;;  %1632 = vmatmul.f32.gmra.mxu3 %v2394_v48  ;;  %v885_v39 = vadd.f32 %v884_v36, %v2656_v62 }
 0x17a   : > { %1324 = vmatmul.f32.gmra.mxu0 %v2403_v54 }
 0x17b   : > { %v970_v44 = vpop.f32.mrf.mxu1  ;;  %v1088_v56 = vpop.f32.mrf.mxu2 }
 0x17c   : > { %v971_v22 = vadd.f32 %v970_v44, %v885_v39  ;;  %v1089_v52 = vadd.f32 %v1088_v56, %v2717_v26  ;;  %v1226_v58 = vpop.f32.mrf.mxu3 }
 0x17e   : > { %1682 = vst [vmem:[%s2722_s12 + $0x70] sm:$0xff] %v971_v22  ;;  %1434 = vmatmul.f32.gmra.mxu1 %v2410_v59  ;;  %v2789_v47 = vadd.f32 %v1226_v58, %v1089_v52  ;;  %v3040_v58 = vld [vmem:[#allocation11_spill] sm:$0xff] }
 0x17f   : > { %v888_v3 = vpop.f32.mrf.mxu0 }
 0x180   : > { %1550 = vmatmul.f32.gmra.mxu2 %v2412_v63  ;;  %1636 = vmatmul.f32.gmra.mxu3 %v2412_v63  ;;  %v889_v48 = vadd.f32 %v888_v3, %v2663_v43 }
 0x182   : > { %1329 = vmatmul.f32.gmra.mxu0 %v2426_v6  ;;  %v3033_v6 = vld [vmem:[#allocation4_spill] sm:$0xff] }
 0x183   : > { %v974_v54 = vpop.f32.mrf.mxu1  ;;  %v1096_v62 = vpop.f32.mrf.mxu2 }
 0x184   : > { %v975_v40 = vadd.f32 %v974_v54, %v889_v48  ;;  %v1097_v46 = vadd.f32 %v1096_v62, %v2717_v26  ;;  %v1230_v21 = vpop.f32.mrf.mxu3 }
 0x186   : > { %1684 = vst [vmem:[%s2722_s12 + $0x80] sm:$0xff] %v975_v40  ;;  %1440 = vmatmul.f32.gmra.mxu1 %v2438_v18  ;;  %v2798_v59 = vadd.f32 %v1230_v21, %v1097_v46  ;;  %v3034_v18 = vld [vmem:[#allocation5_spill] sm:$0xff] }
 0x187   : > { %v892_v15 = vpop.f32.mrf.mxu0 }
 0x188   : > { %1554 = vmatmul.f32.gmra.mxu2 %v2440_v20  ;;  %1640 = vmatmul.f32.gmra.mxu3 %v2440_v20  ;;  %v893_v63 = vadd.f32 %v892_v15, %v2670_v5  ;;  %v3035_v5 = vld [vmem:[#allocation6_spill] sm:$0xff]  ;;  %v3042_v15 = vld [vmem:[#allocation13_spill] sm:$0xff] }
 0x18a   : > { %1334 = vmatmul.f32.gmra.mxu0 %v3033_v6 }
 0x18b   : > { %v978_v43 = vpop.f32.mrf.mxu1  ;;  %v1104_v11 = vpop.f32.mrf.mxu2 }
 0x18c   : > { %v979_v9 = vadd.f32 %v978_v43, %v893_v63  ;;  %v1105_v12 = vadd.f32 %v1104_v11, %v2717_v26  ;;  %v1234_v35 = vpop.f32.mrf.mxu3 }
 0x18e   : > { %1686 = vst [vmem:[%s2722_s12 + $0x90] sm:$0xff] %v979_v9  ;;  %1446 = vmatmul.f32.gmra.mxu1 %v3034_v18  ;;  %v2807_v42 = vadd.f32 %v1234_v35, %v1105_v12  ;;  %v3044_v18 = vld [vmem:[#allocation15_spill] sm:$0xff] }
 0x18f   : > { %v896_v33 = vpop.f32.mrf.mxu0 }
 0x190   : > { %1558 = vmatmul.f32.gmra.mxu2 %v2459_v45  ;;  %1644 = vmatmul.f32.gmra.mxu3 %v2459_v45  ;;  %v897_v20 = vadd.f32 %v896_v33, %v2677_v55  ;;  %v3037_v55 = vld [vmem:[#allocation8_spill] sm:$0xff] }
 0x192   : > { %1339 = vmatmul.f32.gmra.mxu0 %v3035_v5 }
 0x193   : > { %v982_v13 = vpop.f32.mrf.mxu1  ;;  %v1112_v4 = vpop.f32.mrf.mxu2 }
 0x194   : > { %v983_v17 = vadd.f32 %v982_v13, %v897_v20  ;;  %v1113_v19 = vadd.f32 %v1112_v4, %v2717_v26  ;;  %v1238_v29 = vpop.f32.mrf.mxu3 }
 0x196   : > { %1688 = vst [vmem:[%s2722_s12 + $0xa0] sm:$0xff] %v983_v17  ;;  %1452 = vmatmul.f32.gmra.mxu1 %v3036_v37  ;;  %v2816_v61 = vadd.f32 %v1238_v29, %v1113_v19  ;;  %v3046_v29 = vld [vmem:[#allocation17_spill] sm:$0xff] }
 0x197   : > { %v900_v57 = vpop.f32.mrf.mxu0 }
 0x198   : > { %1562 = vmatmul.f32.gmra.mxu2 %v2477_v10  ;;  %1648 = vmatmul.f32.gmra.mxu3 %v2477_v10  ;;  %v901_v45 = vadd.f32 %v900_v57, %v2684_v2  ;;  %v3039_v2 = vld [vmem:[#allocation10_spill] sm:$0xff] }
 0x19a   : > { %1344 = vmatmul.f32.gmra.mxu0 %v3037_v55 }
 0x19b   : > { %v986_v49 = vpop.f32.mrf.mxu1  ;;  %v1120_v24 = vpop.f32.mrf.mxu2 }
 0x19c   : > { %v987_v31 = vadd.f32 %v986_v49, %v901_v45  ;;  %v1121_v28 = vadd.f32 %v1120_v24, %v2717_v26  ;;  %v1242_v53 = vpop.f32.mrf.mxu3 }
 0x19e   : > { %1690 = vst [vmem:[%s2722_s12 + $0xb0] sm:$0xff] %v987_v31  ;;  %1458 = vmatmul.f32.gmra.mxu1 %v3038_v0  ;;  %v2825_v30 = vadd.f32 %v1242_v53, %v1121_v28 }
 0x19f   : > { %v904_v36 = vpop.f32.mrf.mxu0 }
 0x1a0   : > { %1566 = vmatmul.f32.gmra.mxu2 %v2496_v1  ;;  %1652 = vmatmul.f32.gmra.mxu3 %v2496_v1  ;;  %v905_v10 = vadd.f32 %v904_v36, %v2691_v27  ;;  %v3041_v27 = vld [vmem:[#allocation12_spill] sm:$0xff] }
 0x1a2   : > { %1349 = vmatmul.f32.gmra.mxu0 %v3039_v2 }
 0x1a3   : > { %v990_v39 = vpop.f32.mrf.mxu1  ;;  %v1128_v44 = vpop.f32.mrf.mxu2 }
 0x1a4   : > { %v991_v56 = vadd.f32 %v990_v39, %v905_v10  ;;  %v1129_v22 = vadd.f32 %v1128_v44, %v2717_v26  ;;  %v1246_v52 = vpop.f32.mrf.mxu3 }
 0x1a6   : > { %1692 = vst [vmem:[%s2722_s12 + $0xc0] sm:$0xff] %v991_v56  ;;  %1464 = vmatmul.f32.gmra.mxu1 %v3040_v58  ;;  %v2834_v3 = vadd.f32 %v1246_v52, %v1129_v22 }
 0x1a7   : > { %v908_v48 = vpop.f32.mrf.mxu0 }
 0x1a8   : > { %1570 = vmatmul.f32.gmra.mxu2 %v2520_v51  ;;  %1656 = vmatmul.f32.gmra.mxu3 %v2520_v51  ;;  %v909_v1 = vadd.f32 %v908_v48, %v2698_v7  ;;  %v3043_v7 = vld [vmem:[#allocation14_spill] sm:$0xff] }
 0x1aa   : > { %1354 = vmatmul.f32.gmra.mxu0 %v3041_v27 }
 0x1ab   : > { %v994_v54 = vpop.f32.mrf.mxu1  ;;  %v1136_v62 = vpop.f32.mrf.mxu2 }
 0x1ac   : > { %v995_v40 = vadd.f32 %v994_v54, %v909_v1  ;;  %v1137_v46 = vadd.f32 %v1136_v62, %v2717_v26  ;;  %v1250_v21 = vpop.f32.mrf.mxu3 }
 0x1ae   : > { %1694 = vst [vmem:[%s2722_s12 + $0xd0] sm:$0xff] %v995_v40  ;;  %1470 = vmatmul.f32.gmra.mxu1 %v3042_v15  ;;  %v2843_v63 = vadd.f32 %v1250_v21, %v1137_v46 }
 0x1af   : > { %v912_v6 = vpop.f32.mrf.mxu0 }
 0x1b0   : > { %1574 = vmatmul.f32.gmra.mxu2 %v2542_v32  ;;  %1660 = vmatmul.f32.gmra.mxu3 %v2542_v32  ;;  %v913_v51 = vadd.f32 %v912_v6, %v2705_v14  ;;  %v3045_v14 = vld [vmem:[#allocation16_spill] sm:$0xff] }
 0x1b2   : > { %1359 = vmatmul.f32.gmra.mxu0 %v3043_v7 }
 0x1b3   : > { %v998_v43 = vpop.f32.mrf.mxu1  ;;  %v1144_v11 = vpop.f32.mrf.mxu2 }
 0x1b4   : > { %v999_v9 = vadd.f32 %v998_v43, %v913_v51  ;;  %v1145_v12 = vadd.f32 %v1144_v11, %v2717_v26  ;;  %v1254_v35 = vpop.f32.mrf.mxu3 }
 0x1b6   : > { %1696 = vst [vmem:[%s2722_s12 + $0xe0] sm:$0xff] %v999_v9  ;;  %1476 = vmatmul.f32.gmra.mxu1 %v3044_v18  ;;  %v2852_v33 = vadd.f32 %v1254_v35, %v1145_v12 }
 0x1b7   : > { %v916_v20 = vpop.f32.mrf.mxu0 }
 0x1b8   : > { %1578 = vmatmul.f32.gmra.mxu2 %v2560_v25  ;;  %1664 = vmatmul.f32.gmra.mxu3 %v2560_v25  ;;  %v917_v32 = vadd.f32 %v916_v20, %v2712_v41 }
 0x1ba   : > { %1364 = vmatmul.f32.gmra.mxu0 %v3045_v14 }
 0x1bb   : > { %v1002_v5 = vpop.f32.mrf.mxu1  ;;  %v1152_v13 = vpop.f32.mrf.mxu2 }
 0x1bc   : > { %v1003_v4 = vadd.f32 %v1002_v5, %v917_v32  ;;  %v1153_v17 = vadd.f32 %v1152_v13, %v2717_v26  ;;  %v1258_v19 = vpop.f32.mrf.mxu3 }
 0x1be   : > { %1698 = vst [vmem:[%s2722_s12 + $0xf0] sm:$0xff] %v1003_v4  ;;  %1482 = vmatmul.f32.gmra.mxu1 %v3046_v29  ;;  %v2861_v37 = vadd.f32 %v1258_v19, %v1153_v17 }
 0x1bf   : > { %v1290_v57 = vpop.f32.mrf.mxu0 }
 0x1c0   : > { %v1291_v45 = vadd.f32 %v1290_v57, %v2726_v34 }
 0x1c3   : > { %v1393_v25 = vpop.f32.mrf.mxu1  ;;  %v1519_v55 = vpop.f32.mrf.mxu2 }
 0x1c4   : > { %v1394_v41 = vadd.f32 %v1393_v25, %v1291_v45  ;;  %v1605_v49 = vpop.f32.mrf.mxu3 }
 0x1c6   : > { %v1520_v24 = vadd.f32 %v1519_v55, %v1394_v41 }
 0x1c7   : > { %v1295_v31 = vpop.f32.mrf.mxu0 }
 0x1c8   : > { %v1606_v28 = vadd.f32 %v1605_v49, %v1520_v24  ;;  %v1296_v53 = vadd.f32 %v1295_v31, %v2735_v50 }
 0x1ca   : > { %1669 = vst [vmem:[%s2722_s12 + $0x8] sm:$0xff] %v1606_v28 }
 0x1cb   : > { %v1399_v26 = vpop.f32.mrf.mxu1  ;;  %v1523_v0 = vpop.f32.mrf.mxu2 }
 0x1cc   : > { %v1400_v36 = vadd.f32 %v1399_v26, %v1296_v53  ;;  %v1609_v10 = vpop.f32.mrf.mxu3 }
 0x1ce   : > { %v1524_v2 = vadd.f32 %v1523_v0, %v1400_v36 }
 0x1cf   : > { %v1300_v39 = vpop.f32.mrf.mxu0 }
 0x1d0   : > { %v1610_v44 = vadd.f32 %v1609_v10, %v1524_v2  ;;  %v1301_v34 = vadd.f32 %v1300_v39, %v2744_v60 }
 0x1d2   : > { %1671 = vst [vmem:[%s2722_s12 + $0x18] sm:$0xff] %v1610_v44 }
 0x1d3   : > { %v1405_v56 = vpop.f32.mrf.mxu1  ;;  %v1527_v22 = vpop.f32.mrf.mxu2 }
 0x1d4   : > { %v1406_v52 = vadd.f32 %v1405_v56, %v1301_v34  ;;  %v1613_v58 = vpop.f32.mrf.mxu3 }
 0x1d6   : > { %v1528_v48 = vadd.f32 %v1527_v22, %v1406_v52 }
 0x1d7   : > { %v1305_v1 = vpop.f32.mrf.mxu0 }
 0x1d8   : > { %v1614_v50 = vadd.f32 %v1613_v58, %v1528_v48  ;;  %v1306_v27 = vadd.f32 %v1305_v1, %v2753_v8 }
 0x1da   : > { %1673 = vst [vmem:[%s2722_s12 + $0x28] sm:$0xff] %v1614_v50 }
 0x1db   : > { %v1411_v54 = vpop.f32.mrf.mxu1  ;;  %v1531_v62 = vpop.f32.mrf.mxu2 }
 0x1dc   : > { %v1412_v40 = vadd.f32 %v1411_v54, %v1306_v27  ;;  %v1617_v46 = vpop.f32.mrf.mxu3 }
 0x1de   : > { %v1532_v21 = vadd.f32 %v1531_v62, %v1412_v40 }
 0x1df   : > { %v1310_v15 = vpop.f32.mrf.mxu0 }
 0x1e0   : > { %v1618_v60 = vadd.f32 %v1617_v46, %v1532_v21  ;;  %v1311_v6 = vadd.f32 %v1310_v15, %v2762_v16 }
 0x1e2   : > { %1675 = vst [vmem:[%s2722_s12 + $0x38] sm:$0xff] %v1618_v60 }
 0x1e3   : > { %v1417_v51 = vpop.f32.mrf.mxu1  ;;  %v1535_v7 = vpop.f32.mrf.mxu2 }
 0x1e4   : > { %v1418_v43 = vadd.f32 %v1417_v51, %v1311_v6  ;;  %v1621_v11 = vpop.f32.mrf.mxu3 }
 0x1e6   : > { %v1536_v9 = vadd.f32 %v1535_v7, %v1418_v43 }
 0x1e7   : > { %v1315_v12 = vpop.f32.mrf.mxu0 }
 0x1e8   : > { %v1622_v8 = vadd.f32 %v1621_v11, %v1536_v9  ;;  %v1316_v35 = vadd.f32 %v1315_v12, %v2771_v23 }
 0x1ea   : > { %1677 = vst [vmem:[%s2722_s12 + $0x48] sm:$0xff] %v1622_v8 }
 0x1eb   : > { %v1423_v18 = vpop.f32.mrf.mxu1  ;;  %v1539_v20 = vpop.f32.mrf.mxu2 }
 0x1ec   : > { %v1424_v32 = vadd.f32 %v1423_v18, %v1316_v35  ;;  %v1625_v14 = vpop.f32.mrf.mxu3 }
 0x1ee   : > { %v1540_v5 = vadd.f32 %v1539_v20, %v1424_v32 }
 0x1ef   : > { %v1320_v13 = vpop.f32.mrf.mxu0 }
 0x1f0   : > { %v1626_v16 = vadd.f32 %v1625_v14, %v1540_v5  ;;  %v1321_v4 = vadd.f32 %v1320_v13, %v2780_v38 }
 0x1f2   : > { %1679 = vst [vmem:[%s2722_s12 + $0x58] sm:$0xff] %v1626_v16 }
 0x1f3   : > { %v1429_v17 = vpop.f32.mrf.mxu1  ;;  %v1543_v19 = vpop.f32.mrf.mxu2 }
 0x1f4   : > { %v1430_v29 = vadd.f32 %v1429_v17, %v1321_v4  ;;  %v1629_v57 = vpop.f32.mrf.mxu3 }
 0x1f6   : > { %v1544_v45 = vadd.f32 %v1543_v19, %v1430_v29 }
 0x1f7   : > { %v1325_v25 = vpop.f32.mrf.mxu0 }
 0x1f8   : > { %v1630_v23 = vadd.f32 %v1629_v57, %v1544_v45  ;;  %v1326_v55 = vadd.f32 %v1325_v25, %v2789_v47 }
 0x1fa   : > { %1681 = vst [vmem:[%s2722_s12 + $0x68] sm:$0xff] %v1630_v23 }
 0x1fb   : > { %v1435_v41 = vpop.f32.mrf.mxu1  ;;  %v1547_v49 = vpop.f32.mrf.mxu2 }
 0x1fc   : > { %v1436_v24 = vadd.f32 %v1435_v41, %v1326_v55  ;;  %v1633_v31 = vpop.f32.mrf.mxu3 }
 0x1fe   : > { %v1548_v28 = vadd.f32 %v1547_v49, %v1436_v24 }
 0x1ff   : > { %v1330_v53 = vpop.f32.mrf.mxu0 }
 0x200   : > { %v1634_v38 = vadd.f32 %v1633_v31, %v1548_v28  ;;  %v1331_v26 = vadd.f32 %v1330_v53, %v2798_v59 }
 0x202   : > { %1683 = vst [vmem:[%s2722_s12 + $0x78] sm:$0xff] %v1634_v38 }
 0x203   : > { %v1441_v0 = vpop.f32.mrf.mxu1  ;;  %v1551_v36 = vpop.f32.mrf.mxu2 }
 0x204   : > { %v1442_v10 = vadd.f32 %v1441_v0, %v1331_v26  ;;  %v1637_v2 = vpop.f32.mrf.mxu3  ;;  %v1729_v0 = vld [vmem:[%s2722_s12 + $0x10] sm:$0xff] (%p2138_p9) }
 0x205   : > { %1730 = vst [vmem:[%s2904_s30 + $0x20] sm:$0xff] (%p2138_p9), %v1729_v0 }
 0x206   : > { %v1552_v39 = vadd.f32 %v1551_v36, %v1442_v10  ;;  %v1731_v36 = vld [vmem:[%s2722_s12 + $0x18] sm:$0xff] (%p2138_p9)  ;;  %v1733_v10 = vld [vmem:[%s2722_s12 + $0x20] sm:$0xff] (%p2138_p9) }
 0x207   : > { %v1335_v44 = vpop.f32.mrf.mxu0  ;;  %1732 = vst [vmem:[%s2904_s30 + $0x28] sm:$0xff] (%p2138_p9), %v1731_v36 }
 0x208   : > { %v1638_v47 = vadd.f32 %v1637_v2, %v1552_v39  ;;  %v1336_v34 = vadd.f32 %v1335_v44, %v2807_v42  ;;  %v1735_v2 = vld [vmem:[%s2722_s12 + $0x28] sm:$0xff] (%p2138_p9)  ;;  %v1737_v39 = vld [vmem:[%s2722_s12 + $0x30] sm:$0xff] (%p2138_p9)  ;;  %1734 = vst [vmem:[%s2904_s30 + $0x40] sm:$0xff] (%p2138_p9), %v1733_v10  ;;  %v1739_v44 = vld [vmem:[%s2722_s12 + $0x38] sm:$0xff] (%p2138_p9) }
 0x209   : > { %1736 = vst [vmem:[%s2904_s30 + $0x48] sm:$0xff] (%p2138_p9), %v1735_v2 }
 0x20a   : > { %1685 = vst [vmem:[%s2722_s12 + $0x88] sm:$0xff] %v1638_v47  ;;  %v1741_v47 = vld [vmem:[%s2722_s12 + $0x40] sm:$0xff] (%p2138_p9) }
 0x20b   : > { %v1447_v56 = vpop.f32.mrf.mxu1  ;;  %v1555_v22 = vpop.f32.mrf.mxu2  ;;  %1738 = vst [vmem:[%s2904_s30 + $0x60] sm:$0xff] (%p2138_p9), %v1737_v39 }
 0x20c   : > { %v1448_v52 = vadd.f32 %v1447_v56, %v1336_v34  ;;  %v1641_v58 = vpop.f32.mrf.mxu3  ;;  %v1743_v34 = vld [vmem:[%s2722_s12 + $0x48] sm:$0xff] (%p2138_p9)  ;;  %1740 = vst [vmem:[%s2904_s30 + $0x68] sm:$0xff] (%p2138_p9), %v1739_v44  ;;  %v1745_v56 = vld [vmem:[%s2722_s12 + $0x50] sm:$0xff] (%p2138_p9) }
 0x20d   : > { %1742 = vst [vmem:[%s2904_s30 + $0x80] sm:$0xff] (%p2138_p9), %v1741_v47 }
 0x20e   : > { %v1556_v48 = vadd.f32 %v1555_v22, %v1448_v52  ;;  %v1747_v22 = vld [vmem:[%s2722_s12 + $0x58] sm:$0xff] (%p2138_p9)  ;;  %1744 = vst [vmem:[%s2904_s30 + $0x88] sm:$0xff] (%p2138_p9), %v1743_v34  ;;  %v1749_v52 = vld [vmem:[%s2722_s12 + $0x60] sm:$0xff] (%p2138_p9) }
 0x20f   : > { %v1340_v1 = vpop.f32.mrf.mxu0  ;;  %1746 = vst [vmem:[%s2904_s30 + $0xa0] sm:$0xff] (%p2138_p9), %v1745_v56 }
 0x210   : > { %v1642_v59 = vadd.f32 %v1641_v58, %v1556_v48  ;;  %v1341_v50 = vadd.f32 %v1340_v1, %v2816_v61  ;;  %v1751_v58 = vld [vmem:[%s2722_s12 + $0x68] sm:$0xff] (%p2138_p9)  ;;  %1748 = vst [vmem:[%s2904_s30 + $0xa8] sm:$0xff] (%p2138_p9), %v1747_v22  ;;  %v1753_v48 = vld [vmem:[%s2722_s12 + $0x70] sm:$0xff] (%p2138_p9)  ;;  %v1755_v1 = vld [vmem:[%s2722_s12 + $0x78] sm:$0xff] (%p2138_p9) }
 0x211   : > { %1750 = vst [vmem:[%s2904_s30 + $0xc0] sm:$0xff] (%p2138_p9), %v1749_v52 }
 0x212   : > { %1687 = vst [vmem:[%s2722_s12 + $0x98] sm:$0xff] %v1642_v59  ;;  %v1757_v59 = vld [vmem:[%s2722_s12 + $0x80] sm:$0xff] (%p2138_p9) }
 0x213   : > { %v1453_v27 = vpop.f32.mrf.mxu1  ;;  %v1559_v54 = vpop.f32.mrf.mxu2  ;;  %1752 = vst [vmem:[%s2904_s30 + $0xc8] sm:$0xff] (%p2138_p9), %v1751_v58 }
 0x214   : > { %v1454_v62 = vadd.f32 %v1453_v27, %v1341_v50  ;;  %v1645_v40 = vpop.f32.mrf.mxu3  ;;  %1754 = vst [vmem:[%s2904_s30 + $0xe0] sm:$0xff] (%p2138_p9), %v1753_v48  ;;  %v1759_v50 = vld [vmem:[%s2722_s12 + $0x88] sm:$0xff] (%p2138_p9)  ;;  %v1761_v27 = vld [vmem:[%s2722_s12 + $0x90] sm:$0xff] (%p2138_p9) }
 0x215   : > { %1756 = vst [vmem:[%s2904_s30 + $0xe8] sm:$0xff] (%p2138_p9), %v1755_v1 }
 0x216   : > { %v1560_v46 = vadd.f32 %v1559_v54, %v1454_v62  ;;  %1758 = vst [vmem:[%s2904_s30 + $0x100] sm:$0xff] (%p2138_p9), %v1757_v59  ;;  %v1765_v62 = vld [vmem:[%s2722_s12 + $0xa0] sm:$0xff] (%p2138_p9) }
 0x217   : > { %v1345_v21 = vpop.f32.mrf.mxu0  ;;  %1760 = vst [vmem:[%s2904_s30 + $0x108] sm:$0xff] (%p2138_p9), %v1759_v50 }
 0x218   : > { %v1646_v42 = vadd.f32 %v1645_v40, %v1560_v46  ;;  %v1346_v15 = vadd.f32 %v1345_v21, %v2825_v30  ;;  %1762 = vst [vmem:[%s2904_s30 + $0x120] sm:$0xff] (%p2138_p9), %v1761_v27  ;;  %v1769_v46 = vld [vmem:[%s2722_s12 + $0xb0] sm:$0xff] (%p2138_p9) }
 0x219   : > { %v1763_v54 = vld [vmem:[%s2722_s12 + $0x98] sm:$0xff] (%p2138_p9)  ;;  %1766 = vst [vmem:[%s2904_s30 + $0x140] sm:$0xff] (%p2138_p9), %v1765_v62 }
 0x21a   : > { %1689 = vst [vmem:[%s2722_s12 + $0xa8] sm:$0xff] %v1646_v42  ;;  %v1773_v42 = vld [vmem:[%s2722_s12 + $0xc0] sm:$0xff] (%p2138_p9) }
 0x21b   : > { %v1459_v60 = vpop.f32.mrf.mxu1  ;;  %v1563_v6 = vpop.f32.mrf.mxu2  ;;  %1764 = vst [vmem:[%s2904_s30 + $0x128] sm:$0xff] (%p2138_p9), %v1763_v54 }
 0x21c   : > { %v1460_v51 = vadd.f32 %v1459_v60, %v1346_v15  ;;  %v1649_v7 = vpop.f32.mrf.mxu3  ;;  %1770 = vst [vmem:[%s2904_s30 + $0x160] sm:$0xff] (%p2138_p9), %v1769_v46  ;;  %v1777_v60 = vld [vmem:[%s2722_s12 + $0xd0] sm:$0xff] (%p2138_p9) }
 0x21d   : > { %1774 = vst [vmem:[%s2904_s30 + $0x180] sm:$0xff] (%p2138_p9), %v1773_v42 }
 0x21e   : > { %v1564_v43 = vadd.f32 %v1563_v6, %v1460_v51  ;;  %v1781_v51 = vld [vmem:[%s2722_s12 + $0xe0] sm:$0xff] (%p2138_p9)  ;;  %1778 = vst [vmem:[%s2904_s30 + $0x1a0] sm:$0xff] (%p2138_p9), %v1777_v60 }
 0x21f   : > { %v1350_v11 = vpop.f32.mrf.mxu0  ;;  %1782 = vst [vmem:[%s2904_s30 + $0x1c0] sm:$0xff] (%p2138_p9), %v1781_v51 }
 0x220   : > { %v1650_v61 = vadd.f32 %v1649_v7, %v1564_v43  ;;  %v1351_v9 = vadd.f32 %v1350_v11, %v2834_v3  ;;  %v1785_v43 = vld [vmem:[%s2722_s12 + $0xf0] sm:$0xff] (%p2138_p9) }
 0x221   : > { %v1767_v40 = vld [vmem:[%s2722_s12 + $0xa8] sm:$0xff] (%p2138_p9)  ;;  %1786 = vst [vmem:[%s2904_s30 + $0x1e0] sm:$0xff] (%p2138_p9), %v1785_v43 }
 0x222   : > { %1691 = vst [vmem:[%s2722_s12 + $0xb8] sm:$0xff] %v1650_v61 }
 0x223   : > { %v1465_v12 = vpop.f32.mrf.mxu1  ;;  %v1567_v8 = vpop.f32.mrf.mxu2  ;;  %1768 = vst [vmem:[%s2904_s30 + $0x148] sm:$0xff] (%p2138_p9), %v1767_v40 }
 0x224   : > { %v1466_v35 = vadd.f32 %v1465_v12, %v1351_v9  ;;  %v1653_v18 = vpop.f32.mrf.mxu3 }
 0x226   : > { %v1568_v20 = vadd.f32 %v1567_v8, %v1466_v35 }
 0x227   : > { %v1355_v32 = vpop.f32.mrf.mxu0 }
 0x228   : > { %v1654_v30 = vadd.f32 %v1653_v18, %v1568_v20  ;;  %v1356_v14 = vadd.f32 %v1355_v32, %v2843_v63 }
 0x229   : > { %v1771_v21 = vld [vmem:[%s2722_s12 + $0xb8] sm:$0xff] (%p2138_p9) }
 0x22a   : > { %1693 = vst [vmem:[%s2722_s12 + $0xc8] sm:$0xff] %v1654_v30 }
 0x22b   : > { %v1471_v5 = vpop.f32.mrf.mxu1  ;;  %v1571_v13 = vpop.f32.mrf.mxu2  ;;  %1772 = vst [vmem:[%s2904_s30 + $0x168] sm:$0xff] (%p2138_p9), %v1771_v21 }
 0x22c   : > { %v1472_v16 = vadd.f32 %v1471_v5, %v1356_v14  ;;  %v1657_v4 = vpop.f32.mrf.mxu3 }
 0x22e   : > { %v1572_v17 = vadd.f32 %v1571_v13, %v1472_v16 }
 0x22f   : > { %v1360_v19 = vpop.f32.mrf.mxu0 }
 0x230   : > { %v1658_v3 = vadd.f32 %v1657_v4, %v1572_v17  ;;  %v1361_v29 = vadd.f32 %v1360_v19, %v2852_v33  ;;  %v1725_v33 = vld [vmem:[%s2722_s12] sm:$0xff] (%p2138_p9) }
 0x231   : > { %1726 = vst [vmem:[%s2904_s30] sm:$0xff] (%p2138_p9), %v1725_v33  ;;  %v1775_v15 = vld [vmem:[%s2722_s12 + $0xc8] sm:$0xff] (%p2138_p9) }
 0x232   : > { %1695 = vst [vmem:[%s2722_s12 + $0xd8] sm:$0xff] %v1658_v3 }
 0x233   : > { %v1477_v57 = vpop.f32.mrf.mxu1  ;;  %v1575_v45 = vpop.f32.mrf.mxu2  ;;  %1776 = vst [vmem:[%s2904_s30 + $0x188] sm:$0xff] (%p2138_p9), %v1775_v15 }
 0x234   : > { %v1478_v25 = vadd.f32 %v1477_v57, %v1361_v29  ;;  %v1661_v23 = vpop.f32.mrf.mxu3 }
 0x236   : > { %v1576_v55 = vadd.f32 %v1575_v45, %v1478_v25 }
 0x237   : > { %v1365_v41 = vpop.f32.mrf.mxu0 }
 0x238   : > { %v1662_v63 = vadd.f32 %v1661_v23, %v1576_v55  ;;  %v1366_v49 = vadd.f32 %v1365_v41, %v2861_v37  ;;  %v1727_v37 = vld [vmem:[%s2722_s12 + $0x8] sm:$0xff] (%p2138_p9) }
 0x239   : > { %1728 = vst [vmem:[%s2904_s30 + $0x8] sm:$0xff] (%p2138_p9), %v1727_v37  ;;  %v1779_v6 = vld [vmem:[%s2722_s12 + $0xd8] sm:$0xff] (%p2138_p9) }
 0x23a   : > { %1697 = vst [vmem:[%s2722_s12 + $0xe8] sm:$0xff] %v1662_v63 }
 0x23b   : > { %v1483_v24 = vpop.f32.mrf.mxu1  ;;  %v1579_v31 = vpop.f32.mrf.mxu2  ;;  %1780 = vst [vmem:[%s2904_s30 + $0x1a8] sm:$0xff] (%p2138_p9), %v1779_v6 }
 0x23c   : > { %v1484_v28 = vadd.f32 %v1483_v24, %v1366_v49  ;;  %v1665_v53 = vpop.f32.mrf.mxu3 }
 0x23e   : > { %v1580_v38 = vadd.f32 %v1579_v31, %v1484_v28  ;;  %1706 = sbr.rel (!%p2138_p9) target bundleno = 587 (0x24b), region = 59 }
 0x240   : > { %v1666_v26 = vadd.f32 %v1665_v53, %v1580_v38 }
 0x241   : > { %v1783_v7 = vld [vmem:[%s2722_s12 + $0xe8] sm:$0xff] (%p2138_p9) }
 0x242   : > { %1699 = vst [vmem:[%s2722_s12 + $0xf8] sm:$0xff] %v1666_v26 }
 0x243   : > { %1784 = vst [vmem:[%s2904_s30 + $0x1c8] sm:$0xff] %v1783_v7 }
 0x249   : > { %v1787_v11 = vld [vmem:[%s2722_s12 + $0xf8] sm:$0xff] }
 0x24a   : > { %1788 = vst [vmem:[%s2904_s30 + $0x1e8] sm:$0xff] %v1787_v11 }
 0x24b PF: > { %s13_s20 = sadd.s32 1, %s2048_s20   ;;  %s3047_s12 = smov %s2020_s13 }
 0x24c   : > { %p10_p2 = scmp.ge.s32.totalorder %s13_s20, 6   ;;  %s3048_s13 = smov %s2146_s5 }
 0x24d   : > { %s3049_s14 = smov %s2028_s15  ;;  %s3050_s15 = smov %s2143_s4 }
 0x24e   : > { %s3051_s16 = smov %s2040_s18  ;;  %s3052_s17 = smov %s2044_s19 }
 0x24f   : > { %s3053_s18 = smov %s3056_s21  ;;  %s3054_s19 = smov %s3060_s22 }
 0x250   :  { %12 = sbr.rel (!%p10_p2) target bundleno = 5 (0x5), region = 119 }

</bundles_post_ra>
